<compile_context>
chip_gen: v7x
topology: tpu7x:2x2x1
jax: 0.10.0
libtpu: 0.0.40
codegen_flags: <defaults>
</compile_context>

<pallas_src>
import functools

import jax
import jax.numpy as jnp
from jax.experimental import pallas as pl
from jax.experimental.pallas import tpu as pltpu


def _round_up(x, m):
    return (x + m - 1) // m * m


# ----------------------------------------------------------------------------
# Pallas kernel: row-tiled GEMM with fused bias + LeakyReLU
# ----------------------------------------------------------------------------
def _gemm_bias_act_kernel(p_ref, w_ref, b_ref, o_ref, *, apply_lrelu: bool):
    # p_ref: (TM, Kp)  bf16 im2col row tile (batch folded into rows)
    # w_ref: (Kp, Np)  bf16 flattened conv weight (zero padded)
    # b_ref: (1,  Np)  f32 bias (zero padded)
    # o_ref: (TM, Np)  output tile (bf16 for hidden layers, f32 for heads)
    y = jnp.dot(p_ref[...], w_ref[...], preferred_element_type=jnp.float32)
    y = y + b_ref[...]
    if apply_lrelu:
        y = jnp.where(y > 0, y, 0.01 * y)  # LeakyReLU(negative_slope=0.01)
    o_ref[...] = y.astype(o_ref.dtype)


def gemm_bias_act(patches, w_flat, bias, *, apply_lrelu, out_dtype, tm=256):
    """patches: (M, K), w_flat: (K, N), bias: (1, N) -> (M, N) in out_dtype.

    Pads K and N to multiples of 128 (lane-dense loads/stores) and tiles M into
    TM-row blocks (multiple of 8) that form the Pallas grid.
    """
    M, K = patches.shape
    Kw, N = w_flat.shape
    assert K == Kw, (K, Kw)

    Kp = _round_up(max(K, 128), 128)
    Np = _round_up(max(N, 128), 128)
    TM = min(tm, _round_up(M, 8))
    Mp = _round_up(M, TM)

    p = jnp.pad(patches.astype(jnp.bfloat16), ((0, Mp - M), (0, Kp - K)))
    w = jnp.pad(w_flat.astype(jnp.bfloat16), ((0, Kp - K), (0, Np - N)))
    b = jnp.pad(bias.astype(jnp.float32), ((0, 0), (0, Np - N)))

    kernel = functools.partial(_gemm_bias_act_kernel, apply_lrelu=apply_lrelu)
    out = pl.pallas_call(
        kernel,
        out_shape=jax.ShapeDtypeStruct((Mp, Np), out_dtype),
        grid=(Mp // TM,),
        in_specs=[
            pl.BlockSpec((TM, Kp), lambda i: (i, 0)),
            pl.BlockSpec((Kp, Np), lambda i: (0, 0)),
            pl.BlockSpec((1, Np), lambda i: (0, 0)),
        ],
        out_specs=pl.BlockSpec((TM, Np), lambda i: (i, 0)),
        compiler_params=pltpu.CompilerParams(
            dimension_semantics=("parallel",),
            vmem_limit_bytes=64 * 1024 * 1024,
        ),
    )(p, w, b)
    return out[:M, :N]


# ----------------------------------------------------------------------------
# Glue: im2col (pad + strided window extraction) and weight flattening
# ----------------------------------------------------------------------------
def im2col(x_nhwc, kh, kw, stride, pad):
    """x_nhwc: (B, H, W, C) -> patches (B*Ho*Wo, kh*kw*C), Ho, Wo  (bf16)."""
    x_nhwc = x_nhwc.astype(jnp.bfloat16)  # halve HBM traffic of materialized patches
    B, H, W, C = x_nhwc.shape
    xp = jnp.pad(x_nhwc, ((0, 0), (pad, pad), (pad, pad), (0, 0)))
    Ho = (H + 2 * pad - kh) // stride + 1
    Wo = (W + 2 * pad - kw) // stride + 1
    cols = []
    for i in range(kh):
        for j in range(kw):
            cols.append(
                xp[:, i : i + stride * Ho : stride, j : j + stride * Wo : stride, :]
            )
    patches = jnp.concatenate(cols, axis=-1)  # (B, Ho, Wo, kh*kw*C), (kh,kw,ci) order
    return patches.reshape(B * Ho * Wo, kh * kw * C), Ho, Wo


def flatten_weight_oihw(w_oihw):
    """PyTorch OIHW conv weight -> (KH*KW*Cin, Cout) matching im2col (kh,kw,ci) order."""
    w_hwio = jnp.transpose(w_oihw, (2, 3, 1, 0))  # (KH, KW, Cin, Cout)
    KH, KW, Cin, Cout = w_hwio.shape
    return w_hwio.reshape(KH * KW * Cin, Cout)


def conv2d(x_nhwc, w_oihw, bias, *, stride, pad, apply_lrelu, out_dtype, tm=256):
    B = x_nhwc.shape[0]
    Cout, _, KH, KW = w_oihw.shape
    patches, Ho, Wo = im2col(x_nhwc, KH, KW, stride, pad)
    w_flat = flatten_weight_oihw(w_oihw)
    if bias is None:
        bias = jnp.zeros((Cout,), jnp.float32)
    out = gemm_bias_act(
        patches, w_flat, bias.reshape(1, Cout),
        apply_lrelu=apply_lrelu, out_dtype=out_dtype, tm=tm,
    )
    return out.reshape(B, Ho, Wo, Cout)


# ----------------------------------------------------------------------------
# Discriminator forward
# ----------------------------------------------------------------------------
def make_params(key, image_size=32, conv_dim=8, c_dim=5, repeat_num=3):
    """Deterministic synthetic parameters matching the PyTorch module's shapes."""
    params = {"main": []}
    keys = jax.random.split(key, 2 * repeat_num + 2)

    def init(k, shape, scale=0.05):
        return scale * jax.random.normal(k, shape, jnp.float32)

    # layer 0: Conv2d(3, conv_dim, 4, 2, 1) + bias
    cin, cout = 3, conv_dim
    params["main"].append(
        (init(keys[0], (cout, cin, 4, 4)), init(keys[1], (cout,)))
    )
    curr = conv_dim
    for i in range(1, repeat_num):
        params["main"].append(
            (init(keys[2 * i], (curr * 2, curr, 4, 4)),
             init(keys[2 * i + 1], (curr * 2,)))
        )
        curr *= 2
    ks = image_size // (2 ** repeat_num)
    params["conv1_w"] = init(keys[2 * repeat_num], (1, curr, 3, 3))          # bias=False
    params["conv2_w"] = init(keys[2 * repeat_num + 1], (c_dim, curr, ks, ks))  # bias=False
    return params


def discriminator_forward(x_nchw, params):
    # NCHW -> NHWC
    h = jnp.transpose(x_nchw, (0, 2, 3, 1)).astype(jnp.float32)

    # main: [Conv(4,2,1) + LeakyReLU(0.01)] * repeat_num   (hidden activations in bf16)
    for (w, b) in params["main"]:
        h = conv2d(h, w, b, stride=2, pad=1, apply_lrelu=True, out_dtype=jnp.bfloat16)

    B, Hh, Wh, C = h.shape

    # conv1: Conv2d(curr_dim, 1, kernel_size=3, stride=1, padding=1, bias=False)
    out_src = conv2d(h, params["conv1_w"], None, stride=1, pad=1,
                     apply_lrelu=False, out_dtype=jnp.float32)
    out_src = jnp.transpose(out_src, (0, 3, 1, 2))  # back to NCHW: (B, 1, Hh, Wh)

    # conv2: Conv2d(curr_dim, c_dim, kernel_size=Hh, bias=False) -> (B, c_dim)
    # A full-spatial conv is exactly a GEMM over the flattened feature map; the
    # (kh, kw, ci) weight-flatten order equals the (h, w, c) order of h.reshape.
    c_dim = params["conv2_w"].shape[0]
    w2_flat = flatten_weight_oihw(params["conv2_w"])            # (Hh*Wh*C, c_dim)
    out_cls = gemm_bias_act(
        h.reshape(B, Hh * Wh * C), w2_flat, jnp.zeros((1, c_dim), jnp.float32),
        apply_lrelu=False, out_dtype=jnp.float32,
    )                                                            # (B, c_dim)

    return out_src, out_cls


if __name__ == "__main__":
    # Small shapes consistent with the module: image_size=32, conv_dim=8,
    # c_dim=5, repeat_num=3  (kernel_size = 32 / 2^3 = 4).
    key = jax.random.PRNGKey(0)
    kp, kx = jax.random.split(key)
    params = make_params(kp, image_size=32, conv_dim=8, c_dim=5, repeat_num=3)

    x = jax.random.normal(kx, (2, 3, 32, 32), jnp.float32)  # NCHW, like PyTorch

    fwd = jax.jit(lambda inp: discriminator_forward(inp, params))
    out_src, out_cls = fwd(x)
    jax.block_until_ready((out_src, out_cls))

    assert out_src.shape == (2, 1, 4, 4), out_src.shape
    assert out_cls.shape == (2, 5), out_cls.shape
    assert out_src.dtype == jnp.float32 and out_cls.dtype == jnp.float32
    print("KERNEL_OK")
</pallas_src>

<mosaic_0001>
module attributes {stable_mosaic.version = 11 : i64} {
  func.func @_gemm_bias_act_kernel(%arg0: i32, %arg1: memref<256x128xbf16, #tpu.memory_space<vmem>>, %arg2: memref<128x128xbf16, #tpu.memory_space<vmem>>, %arg3: memref<1x128xf32, #tpu.memory_space<vmem>>, %arg4: memref<256x128xbf16, #tpu.memory_space<vmem>>) attributes {dimension_semantics = [#tpu.dimension_semantics<parallel>], iteration_bounds = array<i64: 2>, scalar_prefetch = 0 : i64, scratch_operands = 0 : i64, tpu.core_type = #tpu.core_type<tc>, window_params = [{transform_indices = @transform_0, window_bounds = array<i64: 256, 128>}, {pipeline_mode = #tpu.pipeline_mode<synchronous>, transform_indices = @transform_1, window_bounds = array<i64: 128, 128>}, {pipeline_mode = #tpu.pipeline_mode<synchronous>, transform_indices = @transform_2, window_bounds = array<i64: 1, 128>}, {transform_indices = @transform_3, window_bounds = array<i64: 256, 128>}]} {
    %c0 = arith.constant 0 : index
    %c0_0 = arith.constant 0 : index
    %0 = vector.load %arg1[%c0, %c0_0] : memref<256x128xbf16, #tpu.memory_space<vmem>>, vector<256x128xbf16>
    %c0_1 = arith.constant 0 : index
    %c0_2 = arith.constant 0 : index
    %1 = vector.load %arg2[%c0_1, %c0_2] : memref<128x128xbf16, #tpu.memory_space<vmem>>, vector<128x128xbf16>
    %cst = arith.constant dense<0.000000e+00> : vector<256x128xf32>
    %2 = tpu.matmul %0, %1, %cst {dimension_numbers = #tpu.dot_dimension_numbers<[1], [0], [0], [1], [0, 0, 1, 1], [], []>} : vector<256x128xbf16>, vector<128x128xbf16>, vector<256x128xf32> -> vector<256x128xf32>
    %c0_3 = arith.constant 0 : index
    %c0_4 = arith.constant 0 : index
    %3 = vector.load %arg3[%c0_3, %c0_4] : memref<1x128xf32, #tpu.memory_space<vmem>>, vector<1x128xf32>
    %4 = vector.broadcast %3 : vector<1x128xf32> to vector<256x128xf32>
    %5 = arith.addf %2, %4 : vector<256x128xf32>
    %cst_5 = arith.constant 0.000000e+00 : f32
    %6 = vector.broadcast %cst_5 : f32 to vector<256x128xf32>
    %7 = arith.cmpf ogt, %5, %6 : vector<256x128xf32>
    %cst_6 = arith.constant 0.00999999977 : f32
    %8 = vector.broadcast %cst_6 : f32 to vector<256x128xf32>
    %9 = arith.mulf %8, %5 : vector<256x128xf32>
    %10 = arith.select %7, %5, %9 : vector<256x128xi1>, vector<256x128xf32>
    %11 = arith.truncf %10 : vector<256x128xf32> to vector<256x128xbf16>
    %c0_7 = arith.constant 0 : index
    %c0_8 = arith.constant 0 : index
    %12 = vector.load %arg4[%c0_7, %c0_8] : memref<256x128xbf16, #tpu.memory_space<vmem>>, vector<256x128xbf16>
    tpu.vector_store %arg4[%c0_7, %c0_8], %11 {strides = array<i32>} : memref<256x128xbf16, #tpu.memory_space<vmem>>, vector<256x128xbf16>,
    return
  }
  func.func @transform_0(%arg0: i32) -> (i32, i32) {
    %c0_i32 = arith.constant 0 : i32
    %c0_i32_0 = arith.constant 0 : i32
    return %arg0, %c0_i32 : i32, i32
  }
  func.func @transform_1(%arg0: i32) -> (i32, i32) {
    %c0_i32 = arith.constant 0 : i32
    %c0_i32_0 = arith.constant 0 : i32
    %c0_i32_1 = arith.constant 0 : i32
    return %c0_i32, %c0_i32_0 : i32, i32
  }
  func.func @transform_2(%arg0: i32) -> (i32, i32) {
    %c0_i32 = arith.constant 0 : i32
    %c0_i32_0 = arith.constant 0 : i32
    %c0_i32_1 = arith.constant 0 : i32
    return %c0_i32, %c0_i32_0 : i32, i32
  }
  func.func @transform_3(%arg0: i32) -> (i32, i32) {
    %c0_i32 = arith.constant 0 : i32
    %c0_i32_0 = arith.constant 0 : i32
    return %arg0, %c0_i32 : i32, i32
  }
}

module attributes {stable_mosaic.version = 11 : i64} {
  func.func @_gemm_bias_act_kernel(%arg0: i32, %arg1: memref<128x128xbf16, #tpu.memory_space<vmem>>, %arg2: memref<128x128xbf16, #tpu.memory_space<vmem>>, %arg3: memref<1x128xf32, #tpu.memory_space<vmem>>, %arg4: memref<128x128xbf16, #tpu.memory_space<vmem>>) attributes {dimension_semantics = [#tpu.dimension_semantics<parallel>], iteration_bounds = array<i64: 1>, scalar_prefetch = 0 : i64, scratch_operands = 0 : i64, tpu.core_type = #tpu.core_type<tc>, window_params = [{transform_indices = @transform_0, window_bounds = array<i64: 128, 128>}, {pipeline_mode = #tpu.pipeline_mode<synchronous>, transform_indices = @transform_1, window_bounds = array<i64: 128, 128>}, {pipeline_mode = #tpu.pipeline_mode<synchronous>, transform_indices = @transform_2, window_bounds = array<i64: 1, 128>}, {transform_indices = @transform_3, window_bounds = array<i64: 128, 128>}]} {
    %c0 = arith.constant 0 : index
    %c0_0 = arith.constant 0 : index
    %0 = vector.load %arg1[%c0, %c0_0] : memref<128x128xbf16, #tpu.memory_space<vmem>>, vector<128x128xbf16>
    %c0_1 = arith.constant 0 : index
    %c0_2 = arith.constant 0 : index
    %1 = vector.load %arg2[%c0_1, %c0_2] : memref<128x128xbf16, #tpu.memory_space<vmem>>, vector<128x128xbf16>
    %cst = arith.constant dense<0.000000e+00> : vector<128x128xf32>
    %2 = tpu.matmul %0, %1, %cst {dimension_numbers = #tpu.dot_dimension_numbers<[1], [0], [0], [1], [0, 0, 1, 1], [], []>} : vector<128x128xbf16>, vector<128x128xbf16>, vector<128x128xf32> -> vector<128x128xf32>
    %c0_3 = arith.constant 0 : index
    %c0_4 = arith.constant 0 : index
    %3 = vector.load %arg3[%c0_3, %c0_4] : memref<1x128xf32, #tpu.memory_space<vmem>>, vector<1x128xf32>
    %4 = vector.broadcast %3 : vector<1x128xf32> to vector<128x128xf32>
    %5 = arith.addf %2, %4 : vector<128x128xf32>
    %cst_5 = arith.constant 0.000000e+00 : f32
    %6 = vector.broadcast %cst_5 : f32 to vector<128x128xf32>
    %7 = arith.cmpf ogt, %5, %6 : vector<128x128xf32>
    %cst_6 = arith.constant 0.00999999977 : f32
    %8 = vector.broadcast %cst_6 : f32 to vector<128x128xf32>
    %9 = arith.mulf %8, %5 : vector<128x128xf32>
    %10 = arith.select %7, %5, %9 : vector<128x128xi1>, vector<128x128xf32>
    %11 = arith.truncf %10 : vector<128x128xf32> to vector<128x128xbf16>
    %c0_7 = arith.constant 0 : index
    %c0_8 = arith.constant 0 : index
    %12 = vector.load %arg4[%c0_7, %c0_8] : memref<128x128xbf16, #tpu.memory_space<vmem>>, vector<128x128xbf16>
    tpu.vector_store %arg4[%c0_7, %c0_8], %11 {strides = array<i32>} : memref<128x128xbf16, #tpu.memory_space<vmem>>, vector<128x128xbf16>,
    return
  }
  func.func @transform_0(%arg0: i32) -> (i32, i32) {
    %c0_i32 = arith.constant 0 : i32
    %c0_i32_0 = arith.constant 0 : i32
    return %arg0, %c0_i32 : i32, i32
  }
  func.func @transform_1(%arg0: i32) -> (i32, i32) {
    %c0_i32 = arith.constant 0 : i32
    %c0_i32_0 = arith.constant 0 : i32
    %c0_i32_1 = arith.constant 0 : i32
    return %c0_i32, %c0_i32_0 : i32, i32
  }
  func.func @transform_2(%arg0: i32) -> (i32, i32) {
    %c0_i32 = arith.constant 0 : i32
    %c0_i32_0 = arith.constant 0 : i32
    %c0_i32_1 = arith.constant 0 : i32
    return %c0_i32, %c0_i32_0 : i32, i32
  }
  func.func @transform_3(%arg0: i32) -> (i32, i32) {
    %c0_i32 = arith.constant 0 : i32
    %c0_i32_0 = arith.constant 0 : i32
    return %arg0, %c0_i32 : i32, i32
  }
}

module attributes {stable_mosaic.version = 11 : i64} {
  func.func @_gemm_bias_act_kernel(%arg0: i32, %arg1: memref<32x256xbf16, #tpu.memory_space<vmem>>, %arg2: memref<256x128xbf16, #tpu.memory_space<vmem>>, %arg3: memref<1x128xf32, #tpu.memory_space<vmem>>, %arg4: memref<32x128xbf16, #tpu.memory_space<vmem>>) attributes {dimension_semantics = [#tpu.dimension_semantics<parallel>], iteration_bounds = array<i64: 1>, scalar_prefetch = 0 : i64, scratch_operands = 0 : i64, tpu.core_type = #tpu.core_type<tc>, window_params = [{transform_indices = @transform_0, window_bounds = array<i64: 32, 256>}, {pipeline_mode = #tpu.pipeline_mode<synchronous>, transform_indices = @transform_1, window_bounds = array<i64: 256, 128>}, {pipeline_mode = #tpu.pipeline_mode<synchronous>, transform_indices = @transform_2, window_bounds = array<i64: 1, 128>}, {transform_indices = @transform_3, window_bounds = array<i64: 32, 128>}]} {
    %c0 = arith.constant 0 : index
    %c0_0 = arith.constant 0 : index
    %0 = vector.load %arg1[%c0, %c0_0] : memref<32x256xbf16, #tpu.memory_space<vmem>>, vector<32x256xbf16>
    %c0_1 = arith.constant 0 : index
    %c0_2 = arith.constant 0 : index
    %1 = vector.load %arg2[%c0_1, %c0_2] : memref<256x128xbf16, #tpu.memory_space<vmem>>, vector<256x128xbf16>
    %cst = arith.constant dense<0.000000e+00> : vector<32x128xf32>
    %2 = tpu.matmul %0, %1, %cst {dimension_numbers = #tpu.dot_dimension_numbers<[1], [0], [0], [1], [0, 0, 1, 1], [], []>} : vector<32x256xbf16>, vector<256x128xbf16>, vector<32x128xf32> -> vector<32x128xf32>
    %c0_3 = arith.constant 0 : index
    %c0_4 = arith.constant 0 : index
    %3 = vector.load %arg3[%c0_3, %c0_4] : memref<1x128xf32, #tpu.memory_space<vmem>>, vector<1x128xf32>
    %4 = vector.broadcast %3 : vector<1x128xf32> to vector<32x128xf32>
    %5 = arith.addf %2, %4 : vector<32x128xf32>
    %cst_5 = arith.constant 0.000000e+00 : f32
    %6 = vector.broadcast %cst_5 : f32 to vector<32x128xf32>
    %7 = arith.cmpf ogt, %5, %6 : vector<32x128xf32>
    %cst_6 = arith.constant 0.00999999977 : f32
    %8 = vector.broadcast %cst_6 : f32 to vector<32x128xf32>
    %9 = arith.mulf %8, %5 : vector<32x128xf32>
    %10 = arith.select %7, %5, %9 : vector<32x128xi1>, vector<32x128xf32>
    %11 = arith.truncf %10 : vector<32x128xf32> to vector<32x128xbf16>
    %c0_7 = arith.constant 0 : index
    %c0_8 = arith.constant 0 : index
    %12 = vector.load %arg4[%c0_7, %c0_8] : memref<32x128xbf16, #tpu.memory_space<vmem>>, vector<32x128xbf16>
    tpu.vector_store %arg4[%c0_7, %c0_8], %11 {strides = array<i32>} : memref<32x128xbf16, #tpu.memory_space<vmem>>, vector<32x128xbf16>,
    return
  }
  func.func @transform_0(%arg0: i32) -> (i32, i32) {
    %c0_i32 = arith.constant 0 : i32
    %c0_i32_0 = arith.constant 0 : i32
    return %arg0, %c0_i32 : i32, i32
  }
  func.func @transform_1(%arg0: i32) -> (i32, i32) {
    %c0_i32 = arith.constant 0 : i32
    %c0_i32_0 = arith.constant 0 : i32
    %c0_i32_1 = arith.constant 0 : i32
    return %c0_i32, %c0_i32_0 : i32, i32
  }
  func.func @transform_2(%arg0: i32) -> (i32, i32) {
    %c0_i32 = arith.constant 0 : i32
    %c0_i32_0 = arith.constant 0 : i32
    %c0_i32_1 = arith.constant 0 : i32
    return %c0_i32, %c0_i32_0 : i32, i32
  }
  func.func @transform_3(%arg0: i32) -> (i32, i32) {
    %c0_i32 = arith.constant 0 : i32
    %c0_i32_0 = arith.constant 0 : i32
    return %arg0, %c0_i32 : i32, i32
  }
}

module attributes {stable_mosaic.version = 11 : i64} {
  func.func @_gemm_bias_act_kernel(%arg0: i32, %arg1: memref<32x384xbf16, #tpu.memory_space<vmem>>, %arg2: memref<384x128xbf16, #tpu.memory_space<vmem>>, %arg3: memref<1x128xf32, #tpu.memory_space<vmem>>, %arg4: memref<32x128xf32, #tpu.memory_space<vmem>>) attributes {dimension_semantics = [#tpu.dimension_semantics<parallel>], iteration_bounds = array<i64: 1>, scalar_prefetch = 0 : i64, scratch_operands = 0 : i64, tpu.core_type = #tpu.core_type<tc>, window_params = [{transform_indices = @transform_0, window_bounds = array<i64: 32, 384>}, {pipeline_mode = #tpu.pipeline_mode<synchronous>, transform_indices = @transform_1, window_bounds = array<i64: 384, 128>}, {pipeline_mode = #tpu.pipeline_mode<synchronous>, transform_indices = @transform_2, window_bounds = array<i64: 1, 128>}, {transform_indices = @transform_3, window_bounds = array<i64: 32, 128>}]} {
    %c0 = arith.constant 0 : index
    %c0_0 = arith.constant 0 : index
    %0 = vector.load %arg1[%c0, %c0_0] : memref<32x384xbf16, #tpu.memory_space<vmem>>, vector<32x384xbf16>
    %c0_1 = arith.constant 0 : index
    %c0_2 = arith.constant 0 : index
    %1 = vector.load %arg2[%c0_1, %c0_2] : memref<384x128xbf16, #tpu.memory_space<vmem>>, vector<384x128xbf16>
    %cst = arith.constant dense<0.000000e+00> : vector<32x128xf32>
    %2 = tpu.matmul %0, %1, %cst {dimension_numbers = #tpu.dot_dimension_numbers<[1], [0], [0], [1], [0, 0, 1, 1], [], []>} : vector<32x384xbf16>, vector<384x128xbf16>, vector<32x128xf32> -> vector<32x128xf32>
    %c0_3 = arith.constant 0 : index
    %c0_4 = arith.constant 0 : index
    %3 = vector.load %arg3[%c0_3, %c0_4] : memref<1x128xf32, #tpu.memory_space<vmem>>, vector<1x128xf32>
    %4 = vector.broadcast %3 : vector<1x128xf32> to vector<32x128xf32>
    %5 = arith.addf %2, %4 : vector<32x128xf32>
    %c0_5 = arith.constant 0 : index
    %c0_6 = arith.constant 0 : index
    %6 = vector.load %arg4[%c0_5, %c0_6] : memref<32x128xf32, #tpu.memory_space<vmem>>, vector<32x128xf32>
    tpu.vector_store %arg4[%c0_5, %c0_6], %5 {strides = array<i32>} : memref<32x128xf32, #tpu.memory_space<vmem>>, vector<32x128xf32>,
    return
  }
  func.func @transform_0(%arg0: i32) -> (i32, i32) {
    %c0_i32 = arith.constant 0 : i32
    %c0_i32_0 = arith.constant 0 : i32
    return %arg0, %c0_i32 : i32, i32
  }
  func.func @transform_1(%arg0: i32) -> (i32, i32) {
    %c0_i32 = arith.constant 0 : i32
    %c0_i32_0 = arith.constant 0 : i32
    %c0_i32_1 = arith.constant 0 : i32
    return %c0_i32, %c0_i32_0 : i32, i32
  }
  func.func @transform_2(%arg0: i32) -> (i32, i32) {
    %c0_i32 = arith.constant 0 : i32
    %c0_i32_0 = arith.constant 0 : i32
    %c0_i32_1 = arith.constant 0 : i32
    return %c0_i32, %c0_i32_0 : i32, i32
  }
  func.func @transform_3(%arg0: i32) -> (i32, i32) {
    %c0_i32 = arith.constant 0 : i32
    %c0_i32_0 = arith.constant 0 : i32
    return %arg0, %c0_i32 : i32, i32
  }
}

module attributes {stable_mosaic.version = 11 : i64} {
  func.func @_gemm_bias_act_kernel(%arg0: i32, %arg1: memref<8x512xbf16, #tpu.memory_space<vmem>>, %arg2: memref<512x128xbf16, #tpu.memory_space<vmem>>, %arg3: memref<1x128xf32, #tpu.memory_space<vmem>>, %arg4: memref<8x128xf32, #tpu.memory_space<vmem>>) attributes {dimension_semantics = [#tpu.dimension_semantics<parallel>], iteration_bounds = array<i64: 1>, scalar_prefetch = 0 : i64, scratch_operands = 0 : i64, tpu.core_type = #tpu.core_type<tc>, window_params = [{transform_indices = @transform_0, window_bounds = array<i64: 8, 512>}, {pipeline_mode = #tpu.pipeline_mode<synchronous>, transform_indices = @transform_1, window_bounds = array<i64: 512, 128>}, {pipeline_mode = #tpu.pipeline_mode<synchronous>, transform_indices = @transform_2, window_bounds = array<i64: 1, 128>}, {transform_indices = @transform_3, window_bounds = array<i64: 8, 128>}]} {
    %c0 = arith.constant 0 : index
    %c0_0 = arith.constant 0 : index
    %0 = vector.load %arg1[%c0, %c0_0] : memref<8x512xbf16, #tpu.memory_space<vmem>>, vector<8x512xbf16>
    %c0_1 = arith.constant 0 : index
    %c0_2 = arith.constant 0 : index
    %1 = vector.load %arg2[%c0_1, %c0_2] : memref<512x128xbf16, #tpu.memory_space<vmem>>, vector<512x128xbf16>
    %cst = arith.constant dense<0.000000e+00> : vector<8x128xf32>
    %2 = tpu.matmul %0, %1, %cst {dimension_numbers = #tpu.dot_dimension_numbers<[1], [0], [0], [1], [0, 0, 1, 1], [], []>} : vector<8x512xbf16>, vector<512x128xbf16>, vector<8x128xf32> -> vector<8x128xf32>
    %c0_3 = arith.constant 0 : index
    %c0_4 = arith.constant 0 : index
    %3 = vector.load %arg3[%c0_3, %c0_4] : memref<1x128xf32, #tpu.memory_space<vmem>>, vector<1x128xf32>
    %4 = vector.broadcast %3 : vector<1x128xf32> to vector<8x128xf32>
    %5 = arith.addf %2, %4 : vector<8x128xf32>
    %c0_5 = arith.constant 0 : index
    %c0_6 = arith.constant 0 : index
    %6 = vector.load %arg4[%c0_5, %c0_6] : memref<8x128xf32, #tpu.memory_space<vmem>>, vector<8x128xf32>
    tpu.vector_store %arg4[%c0_5, %c0_6], %5 {strides = array<i32>} : memref<8x128xf32, #tpu.memory_space<vmem>>, vector<8x128xf32>,
    return
  }
  func.func @transform_0(%arg0: i32) -> (i32, i32) {
    %c0_i32 = arith.constant 0 : i32
    %c0_i32_0 = arith.constant 0 : i32
    return %arg0, %c0_i32 : i32, i32
  }
  func.func @transform_1(%arg0: i32) -> (i32, i32) {
    %c0_i32 = arith.constant 0 : i32
    %c0_i32_0 = arith.constant 0 : i32
    %c0_i32_1 = arith.constant 0 : i32
    return %c0_i32, %c0_i32_0 : i32, i32
  }
  func.func @transform_2(%arg0: i32) -> (i32, i32) {
    %c0_i32 = arith.constant 0 : i32
    %c0_i32_0 = arith.constant 0 : i32
    %c0_i32_1 = arith.constant 0 : i32
    return %c0_i32, %c0_i32_0 : i32, i32
  }
  func.func @transform_3(%arg0: i32) -> (i32, i32) {
    %c0_i32 = arith.constant 0 : i32
    %c0_i32_0 = arith.constant 0 : i32
    return %arg0, %c0_i32 : i32, i32
  }
}

</mosaic_0001>

<bundles_post_ra>
// kernel: _lambda_.5
= control target key start
LH: loop header
LB: loop body
LE: loop exit
PB: predicated region body
PF: predicated region fallthrough
CT: control target
= control target key end

     0   :  { %8 = vsyncpa [#allocation3], 0  ;;  %s1836_s0 = inlined_call_operand.hbm [shape: bf16[512,128], index: 0, kind: input, shape index: {}]   ;;  %s1837_s1 = inlined_call_operand.hbm [shape: bf16[128,128], index: 1, kind: input, shape index: {}]   ;;  %s1838_s2 = inlined_call_operand.hbm [shape: f32[1,128], index: 2, kind: input, shape index: {}]   ;;  %s1839_s3 = inlined_call_operand.hbm [shape: bf16[512,128], index: 3, kind: output, shape index: {}]  }
   0x1   :  { %10 = vsyncpa [#allocation3 + $0x1], 0 }
   0x2   :  { %11 = vsyncpa [#allocation6], 0 }
   0x3   :  { %12 = vsyncpa [#allocation4], 0 }
   0x4   :  { %14 = vsyncpa [#allocation4 + $0x1], 0  ;;  %s1514_s12 = smov 0   ;;  %s1516_s13 = smov 0  }
   0x5   :  { %s1518_s14 = smov 0   ;;  %s1520_s15 = smov 0  }
   0x6 LB: > { %s1535_s16 = sadd.s32 4294967295, %s1484_s15   ;;  %s941_s17 = sadd.s32 4294967294, %s1484_s15   ;;  %s1484_s15 = sphi %s1520_s15, %s1859_s15   ;;  %s1480_s14 = sphi %s1518_s14, %s1858_s14   ;;  %s1476_s13 = sphi %s1516_s13, %s1857_s13   ;;  %s1472_s12 = sphi %s1514_s12, %s1856_s12  }
   0x7   : > { %p40_p0 = scmp.ne.s32.totalorder %s1476_s13, %s1472_s12  ;;  %p1840_p1 = scmp.eq.s32.totalorder %s1535_s16, 0 }
   0x8   : > { %p112_p3 = scmp.eq.s32.totalorder %s941_s17, 1  ;;  %p942_p5 = scmp.ge.s32.totalorder %s1484_s15, 1 }
   0x9   : > { %p1544_p4 = por %p1840_p1, %p40_p0  ;;  %p119_p7 = scmp.lt.s32.totalorder %s1484_s15, 3 }
   0xa   : > { %p1549_p6 = por %p112_p3, %p40_p0  ;;  %s1486_s21 = smov [#allocation5]  }
   0xb   : > { %s1843_s18 = scalar_select %p1544_p4, 1, 0 }
   0xc   : > { %s1844_s19 = scalar_select %p1549_p6, 1, 0 }
   0xd   : > { %p1554_p8 = pnand %p942_p5, %p119_p7  ;;  %s131_s22 = sshll.u32 %s1486_s21, 4  ;;  %s1558_s22 = int_to_ptr.vmem [resolvable:$true] %s131_s22 }
   0xe   : > { %s1487_s24 = smov [#allocation7]   ;;  %s1328_s28 = scalar_lea.hbm %s1837_s1, 1024 }
   0xf   : > { %p1245_p9 = pneg %p1554_p8  ;;  %s145_s25 = sshll.u32 %s1487_s24, 4  ;;  %s1569_s25 = int_to_ptr.vmem [resolvable:$true] %s145_s25 }
  0x10   : > { %p1329_p12 = scmp.ne.s32.totalorder %s1837_s1, %s1328_s28  ;;  %p1335_p5 = scmp.lt.u32.totalorder %s1328_s28, %s1837_s1 }
  0x11   : > { %p1565_p11 = pnand %p1245_p9, %p1840_p1 }
  0x13   : > { %p1330_p13 = pneg %p1565_p11 }
  0x15   : > { %p1331_p0 = pnand %p1330_p13, %p1329_p12 }
  0x17   : > { %p1332_p3 = pneg %p1331_p0 }
  0x19   : > { %p1337_p7 = pnand %p1335_p5, %p1332_p3 }
  0x1b   : > { %1340 = shalt.err (!%p1337_p7)
}
  0x1c   : > { %s1341_s6 = scalar_lea.vmem %s1558_s22, 1024  ;;  %p1349_p2 = scmp.lt.s32.totalorder %s1558_s22, %s1558_s22 }
  0x1d   : > { %p1342_p9 = scmp.ne.s32.totalorder %s1558_s22, %s1341_s6  ;;  %p1350_p12 = scmp.lt.s32.totalorder %s1341_s6, %s1341_s6 }
  0x1f   : > { %p1344_p10 = pnand %p1342_p9, %p1330_p13  ;;  %p1351_p0 = por %p1350_p12, %p1349_p2 }
  0x21   : > { %p1345_p1 = pneg %p1344_p10 }
  0x23   : > { %p1352_p6 = pnand %p1351_p0, %p1345_p1 }
  0x25   : > { %1355 = shalt.err (!%p1352_p6)
}
  0x26   : > { %s1488_s7 = smov 64   ;;  %s1489_s8 = smov 4  }
  0x27   : > { %1248 = dma.hbm_to_vmem [thread:$0]  (!%p1565_p11), %s1837_s1, 1024, %s1558_s22, [#allocation6], %s1488_s7, %s1488_s7, %s1489_s8  }
  0x28   : > { %s1356_s21 = scalar_lea.hbm %s1838_s2, 16 }
  0x29   : > { %p1357_p1 = scmp.ne.s32.totalorder %s1838_s2, %s1356_s21  ;;  %p1363_p10 = scmp.lt.u32.totalorder %s1356_s21, %s1838_s2 }
  0x2b   : > { %p1359_p2 = pnand %p1357_p1, %p1330_p13 }
  0x2d   : > { %p1360_p6 = pneg %p1359_p2 }
  0x2f   : > { %p1365_p3 = pnand %p1363_p10, %p1360_p6 }
  0x31   : > { %1368 = shalt.err (!%p1365_p3)
}
  0x32   : > { %s1369_s22 = scalar_lea.vmem %s1569_s25, 16  ;;  %s1376_s29 = scalar_lea.vmem %s1569_s25, 32 }
  0x33   : > { %p1370_p5 = scmp.ne.s32.totalorder %s1569_s25, %s1369_s22  ;;  %p1377_p12 = scmp.lt.s32.totalorder %s1569_s25, %s1569_s25 }
  0x34   : > { %p1378_p0 = scmp.lt.s32.totalorder %s1376_s29, %s1369_s22 }
  0x35   : > { %p1372_p7 = pnand %p1370_p5, %p1330_p13 }
  0x36   : > { %p1379_p1 = por %p1378_p0, %p1377_p12 }
  0x37   : > { %p1373_p9 = pneg %p1372_p7 }
  0x39   : > { %p1380_p2 = pnand %p1379_p1, %p1373_p9 }
  0x3b   : > { %1383 = shalt.err (!%p1380_p2)
}
  0x3c   : > { %1251 = dma.hbm_to_vmem [thread:$0]  (!%p1565_p11), %s1838_s2, 16, %s1569_s25, [#allocation6]  }
  0x3d   : > { %s1628_s5 = sadd.s32 1, %s1484_s15   ;;  %s27_s23 = sadd.s32 1, %s1480_s14 }
  0x3e   : > { %s24_s6 = ssub.s32 %s1484_s15, %s1628_s5  ;;  %p34_p13 = scmp.ne.s32.totalorder %s1480_s14, %s1476_s13 }
  0x3f   : > { %p25_p6 = scmp.eq.s32.totalorder %s24_s6, 0  ;;  %p35_p10 = scmp.eq.s32.totalorder %s1484_s15, 0 }
  0x40   : > { %p1847_p3 = scmp.eq.s32.totalorder %s1535_s16, 1  ;;  %p1262_p7 = scmp.lt.s32.totalorder %s1484_s15, 2 }
  0x41   : > { %s1644_s10 = scalar_select %p25_p6, %s1480_s14, %s27_s23  }
  0x42   : > { %p1638_p5 = por %p1847_p3, %p34_p13  ;;  %p36_p9 = por %p35_p10, %p34_p13 }
  0x43   : > { %s156_s11 = sand.u32 1, %s1480_s14   ;;  %s1016_s25 = sshll.u32 %s1484_s15, 11 }
  0x44   : > { %s1848_s9 = scalar_select %p1638_p5, 1, 0 }
  0x45   : > { %s946_s17 = sshll.u32 %s156_s11, 7  ;;  %s1651_s26 = scalar_lea.hbm %s1836_s0, %s1016_s25 }
  0x46   : > { %s160_s27 = scalar_lea.vmem [#allocation2], %s946_s17  ;;  %p1655_p11 = pnand %p1262_p7, %p36_p9 }
  0x47   : > { %s167_s28 = sshll.u32 %s160_s27, 4  ;;  %s1659_s29 = scalar_lea.sflag [#allocation3], %s156_s11  ;;  %s1653_s28 = int_to_ptr.vmem [resolvable:$true] %s167_s28 }
  0x48   : > { %s1384_s30 = scalar_lea.hbm %s1651_s26, 2048  ;;  %p1386_p0 = pneg %p1655_p11 }
  0x49   : > { %p1385_p12 = scmp.ne.s32.totalorder %s1651_s26, %s1384_s30  ;;  %s1389_s6 = scalar_lea.hbm %s1836_s0, 4096 }
  0x4a   : > { %p1390_p13 = scmp.lt.u32.totalorder %s1651_s26, %s1836_s0  ;;  %p1391_p6 = scmp.lt.u32.totalorder %s1389_s6, %s1384_s30 }
  0x4b   : > { %p1387_p1 = pnand %p1386_p0, %p1385_p12  ;;  %p1393_p3 = scmp.lt.u32.totalorder %s1384_s30, %s1651_s26 }
  0x4c   : > { %p1392_p10 = por %p1391_p6, %p1390_p13 }
  0x4d   : > { %p1388_p2 = pneg %p1387_p1 }
  0x4e   : > { %p1394_p7 = por %p1393_p3, %p1392_p10 }
  0x50   : > { %p1395_p9 = pnand %p1394_p7, %p1388_p2 }
  0x52   : > { %1398 = shalt.err (!%p1395_p9)
}
  0x53   : > { %s1399_s11 = scalar_lea.vmem %s1653_s28, 2048  ;;  %s1490_s21 = smov [#allocation2]  }
  0x54   : > { %p1400_p12 = scmp.ne.s32.totalorder %s1653_s28, %s1399_s11  ;;  %s1404_s24 = sshll.u32 %s1490_s21, 4  ;;  %s1405_s24 = int_to_ptr.vmem [resolvable:$false] %s1404_s24 }
  0x55   : > { %s1406_s27 = scalar_lea.vmem %s1405_s24, 4096  ;;  %p1407_p4 = scmp.lt.s32.totalorder %s1653_s28, %s1405_s24 }
  0x56   : > { %p1402_p1 = pnand %p1400_p12, %p1386_p0  ;;  %p1408_p13 = scmp.lt.s32.totalorder %s1406_s27, %s1399_s11 }
  0x58   : > { %p1403_p5 = pneg %p1402_p1  ;;  %p1409_p6 = por %p1408_p13, %p1407_p4 }
  0x5a   : > { %p1410_p10 = pnand %p1409_p6, %p1403_p5 }
  0x5c   : > { %1413 = shalt.err (!%p1410_p10)
}
  0x5d   : > { %1255 = dma.hbm_to_vmem [thread:$0]  (!%p1655_p11), %s1651_s26, 2048, %s1653_s28, %s1659_s29, %s1488_s7, %s1488_s7, %s1489_s8  }
  0x5e   : > { %179 = sbr.rel (%p1554_p8) target bundleno = 407 (0x197), region = 32  ;;  %s1693_s30 = sand.u32 (!%p1554_p8), 1, %s1476_s13  }
  0x5f   : > { %s950_s4 = sshll.u32 (!%p1554_p8), %s1693_s30, 7  ;;  %s182_s23 = scalar_lea.sflag (!%p1554_p8), [#allocation3], %s1693_s30 }
  0x60   : > { %s1699_s22 = scalar_lea.vmem (!%p1554_p8), [#allocation2], %s950_s4  ;;  %p1850_p4 = scmp.ne.s32.totalorder (!%p1554_p8), %s1843_s18, 0 }
  0x65   : > { %1459 = dma.done.wait (%p1850_p4), %s182_s23, 2048  }
  0x66   : > { %1461 = vsyncadd (%p1850_p4), %s182_s23, 4294965248  ;;  %p1851_p5 = scmp.eq.s32.totalorder %s1535_s16, 0 }
  0x68   : > { %1463 = dma.done.wait (%p1851_p5), [#allocation6], 1040   ;;  %p1852_p8 = pmov %p1851_p5 }
  0x69   : > { %v1304_v0 = vld [vmem:[#allocation5] sm:$0xff]   ;;  %v1305_v1 = vld [vmem:[#allocation5 + $0x8] sm:$0xff]   ;;  %v1306_v2 = vld [vmem:[#allocation5 + $0x10] sm:$0xff]   ;;  %s1741_s18 = scalar_lea.vmem [#allocation8], %s950_s4  ;;  %s1049_s20 = sshll.u32 %s1535_s16, 11 }
  0x6a   : > { %1465 = vsyncadd (%p1852_p8), [#allocation6], 4294966256  ;;  %1169 = vmatprep.subr.bf16.mxu0 %v1304_v0  ;;  %1217 = vmatprep.subr.bf16.mxu1 %v1304_v0  ;;  %v1307_v3 = vld [vmem:[#allocation5 + $0x18] sm:$0xff]   ;;  %v1312_v4 = vld [vmem:[%s1699_s22] sm:$0xff]   ;;  %s849_s7 = sshll.u32 %s1741_s18, 4  ;;  %s1789_s28 = scalar_lea.hbm %s1839_s3, %s1049_s20  ;;  %s1791_s7 = int_to_ptr.vmem [resolvable:$true] %s849_s7 }
  0x6b   : > { %1170 = vmatpush3.bf16.msra.mxu0 %v1304_v0  ;;  %1225 = vmatpush3.bf16.msra.mxu1 %v1304_v0  ;;  %v1313_v5 = vld [vmem:[%s1699_s22 + $0x40] sm:$0xff]   ;;  %v1309_v7 = vld [vmem:[#allocation5 + $0x28] sm:$0xff]   ;;  %v1310_v8 = vld [vmem:[#allocation5 + $0x30] sm:$0xff]   ;;  %s836_s16 = scalar_lea.sflag [#allocation4], %s1693_s30  ;;  %s1414_s29 = scalar_lea.vmem %s1791_s7, 2048 }
  0x6c   : > { %1171 = vmatprep.subr.bf16.mxu0 %v1305_v1  ;;  %1218 = vmatprep.subr.bf16.mxu1 %v1305_v1  ;;  %v1308_v6 = vld [vmem:[#allocation5 + $0x20] sm:$0xff]   ;;  %v1311_v9 = vld [vmem:[#allocation5 + $0x38] sm:$0xff]   ;;  %v1314_v10 = vld [vmem:[%s1699_s22 + $0x8] sm:$0xff]   ;;  %p1415_p11 = scmp.ne.s32.totalorder %s1791_s7, %s1414_s29  ;;  %p1853_p0 = scmp.ne.s32.totalorder %s1848_s9, 0 }
  0x6d   : > { %1185 = vmatprep.mubr.bf16.mxu0 %v1312_v4  ;;  %1201 = vmatprep.mubr.bf16.mxu1 %v1313_v5  ;;  %v1315_v11 = vld [vmem:[%s1699_s22 + $0x48] sm:$0xff]   ;;  %v1316_v12 = vld [vmem:[%s1699_s22 + $0x10] sm:$0xff]   ;;  %v1318_v14 = vld [vmem:[%s1699_s22 + $0x18] sm:$0xff]   ;;  %s1491_s6 = smov [#allocation8]  }
  0x6e   : > { %v1317_v13 = vld [vmem:[%s1699_s22 + $0x50] sm:$0xff]   ;;  %v1319_v15 = vld [vmem:[%s1699_s22 + $0x58] sm:$0xff]   ;;  %v1320_v16 = vld [vmem:[%s1699_s22 + $0x20] sm:$0xff]   ;;  %p1416_p2 = pnand %p1415_p11, %p1853_p0  ;;  %s1418_s17 = sshll.u32 %s1491_s6, 4  ;;  %s1419_s17 = int_to_ptr.vmem [resolvable:$false] %s1418_s17 }
  0x6f   : > { %1172 = vmatpush3.bf16.msra.mxu0 %v1305_v1  ;;  %1226 = vmatpush3.bf16.msra.mxu1 %v1305_v1  ;;  %v1321_v17 = vld [vmem:[%s1699_s22 + $0x60] sm:$0xff]   ;;  %v1322_v18 = vld [vmem:[%s1699_s22 + $0x28] sm:$0xff]   ;;  %v1324_v20 = vld [vmem:[%s1699_s22 + $0x30] sm:$0xff]   ;;  %s1420_s25 = scalar_lea.vmem %s1419_s17, 4096  ;;  %p1421_p7 = scmp.lt.s32.totalorder %s1791_s7, %s1419_s17 }
  0x70   : > { %1173 = vmatprep.subr.bf16.mxu0 %v1306_v2  ;;  %1219 = vmatprep.subr.bf16.mxu1 %v1306_v2  ;;  %v1323_v19 = vld [vmem:[%s1699_s22 + $0x68] sm:$0xff]   ;;  %v1325_v21 = vld [vmem:[%s1699_s22 + $0x70] sm:$0xff]   ;;  %v1326_v22 = vld [vmem:[%s1699_s22 + $0x38] sm:$0xff]   ;;  %p1417_p3 = pneg %p1416_p2  ;;  %p1422_p9 = scmp.lt.s32.totalorder %s1420_s25, %s1414_s29 }
  0x71   : > { %v1327_v23 = vld [vmem:[%s1699_s22 + $0x78] sm:$0xff]   ;;  %v1725_v24 = vld [vmem:[#allocation7] ss:$0 sm:$0xff] }
  0x72   : > { %p1423_p12 = por %p1422_p9, %p1421_p7 }
  0x73   : > { %1174 = vmatpush3.bf16.msra.mxu0 %v1306_v2  ;;  %1227 = vmatpush3.bf16.msra.mxu1 %v1306_v2 }
  0x74   : > { %1175 = vmatprep.subr.bf16.mxu0 %v1307_v3  ;;  %1220 = vmatprep.subr.bf16.mxu1 %v1307_v3  ;;  %p1424_p1 = pnand %p1423_p12, %p1417_p3 }
  0x77   : > { %1176 = vmatpush3.bf16.msra.mxu0 %v1307_v3  ;;  %1228 = vmatpush3.bf16.msra.mxu1 %v1307_v3 }
  0x78   : > { %1177 = vmatprep.subr.bf16.mxu0 %v1308_v6  ;;  %1221 = vmatprep.subr.bf16.mxu1 %v1308_v6 }
  0x7b   : > { %1178 = vmatpush3.bf16.msra.mxu0 %v1308_v6  ;;  %1229 = vmatpush3.bf16.msra.mxu1 %v1308_v6 }
  0x7c   : > { %1179 = vmatprep.subr.bf16.mxu0 %v1309_v7  ;;  %1222 = vmatprep.subr.bf16.mxu1 %v1309_v7 }
  0x7f   : > { %1180 = vmatpush3.bf16.msra.mxu0 %v1309_v7  ;;  %1230 = vmatpush3.bf16.msra.mxu1 %v1309_v7 }
  0x80   : > { %1181 = vmatprep.subr.bf16.mxu0 %v1310_v8  ;;  %1223 = vmatprep.subr.bf16.mxu1 %v1310_v8 }
  0x83   : > { %1182 = vmatpush3.bf16.msra.mxu0 %v1310_v8  ;;  %1231 = vmatpush3.bf16.msra.mxu1 %v1310_v8 }
  0x84   : > { %1183 = vmatprep.subr.bf16.mxu0 %v1311_v9  ;;  %1224 = vmatprep.subr.bf16.mxu1 %v1311_v9 }
  0x87   : > { %1184 = vmatpush3.bf16.msra.mxu0 %v1311_v9  ;;  %1232 = vmatpush3.bf16.msra.mxu1 %v1311_v9 }
  0x8a   : > { %1186 = vmatmul.mubr.bf16.vlgmr.msra.gmra.mrb[0].mxu0 %v1314_v10  ;;  %1202 = vmatmul.mubr.bf16.vlgmr.msra.gmra.mrb[0].mxu1 %v1315_v11 }
  0x8b   : > { %1189 = vmatprep.mubr.bf16.mxu0 %v1316_v12  ;;  %1205 = vmatprep.mubr.bf16.mxu1 %v1317_v13 }
  0x92   : > { %1190 = vmatmul.mubr.bf16.gmra.mrb[4].mxu0 %v1318_v14  ;;  %1206 = vmatmul.mubr.bf16.gmra.mrb[4].mxu1 %v1319_v15 }
  0x93   : > { %1193 = vmatprep.mubr.bf16.mxu0 %v1320_v16  ;;  %1209 = vmatprep.mubr.bf16.mxu1 %v1321_v17 }
  0x9a   : > { %1194 = vmatmul.mubr.bf16.gmra.mrb[8].mxu0 %v1322_v18  ;;  %1210 = vmatmul.mubr.bf16.gmra.mrb[8].mxu1 %v1323_v19 }
  0x9b   : > { %1197 = vmatprep.mubr.bf16.mxu0 %v1324_v20  ;;  %1213 = vmatprep.mubr.bf16.mxu1 %v1325_v21 }
  0xa2   : > { %1198 = vmatmul.mubr.bf16.gmra.mrb[12].mxu0 %v1326_v22  ;;  %1214 = vmatmul.mubr.bf16.gmra.mrb[12].mxu1 %v1327_v23 }
 0x15d   : > { %v1187_v25 = vpop.f32.mrb[0].mxu0  ;;  %v1203_v26 = vpop.f32.mrb[0].mxu1 }
 0x15e   : > { %v461_v27 = vadd.f32 %v1187_v25, %v1725_v24  ;;  %v525_v28 = vadd.f32 %v1203_v26, %v1725_v24  ;;  %v452_v29 = vpop.f32.mrb[1].mxu0  ;;  %v516_v30 = vpop.f32.mrb[1].mxu1 }
 0x15f   : > { %v453_v31 = vadd.f32 %v1725_v24, %v452_v29  ;;  %v517_v32 = vadd.f32 %v1725_v24, %v516_v30  ;;  %v1188_v33 = vpop.f32.mrb[2].mxu0  ;;  %v1204_v34 = vpop.f32.mrb[2].mxu1 }
 0x160   : > { %vm581_vm0 = vcmp.gt.f32.partialorder %v461_v27, 0.0  ;;  %v613_v35 = vmul.f32 0.01, %v461_v27  ;;  %vm597_vm1 = vcmp.gt.f32.partialorder %v525_v28, 0.0  ;;  %v629_v36 = vmul.f32 0.01, %v525_v28 }
 0x161   : > { %vm579_vm2 = vcmp.gt.f32.partialorder %v453_v31, 0.0  ;;  %v611_v37 = vmul.f32 0.01, %v453_v31  ;;  %vm595_vm3 = vcmp.gt.f32.partialorder %v517_v32, 0.0  ;;  %v627_v38 = vmul.f32 0.01, %v517_v32 }
 0x162   : > { %v464_v39 = vadd.f32 %v1188_v33, %v1725_v24  ;;  %v528_v40 = vadd.f32 %v1204_v34, %v1725_v24  ;;  %v455_v41 = vpop.f32.mrb[3].mxu0  ;;  %v519_v42 = vpop.f32.mrb[3].mxu1  ;;  %v645_v43 = vsel %vm581_vm0, %v461_v27, %v613_v35  ;;  %v661_v44 = vsel %vm597_vm1, %v525_v28, %v629_v36 }
 0x163   : > { %v456_v45 = vadd.f32 %v1725_v24, %v455_v41  ;;  %v520_v46 = vadd.f32 %v1725_v24, %v519_v42  ;;  %v643_v51 = vsel %vm579_vm2, %v453_v31, %v611_v37  ;;  %v659_v52 = vsel %vm595_vm3, %v517_v32, %v627_v38 }
 0x164   : > { %vm582_vm4 = vcmp.gt.f32.partialorder %v464_v39, 0.0  ;;  %v614_v47 = vmul.f32 0.01, %v464_v39  ;;  %vm598_vm5 = vcmp.gt.f32.partialorder %v528_v40, 0.0  ;;  %v630_v48 = vmul.f32 0.01, %v528_v40 }
 0x165   : > { %vm580_vm6 = vcmp.gt.f32.partialorder %v456_v45, 0.0  ;;  %v612_v49 = vmul.f32 0.01, %v456_v45  ;;  %vm596_vm7 = vcmp.gt.f32.partialorder %v520_v46, 0.0  ;;  %v628_v50 = vmul.f32 0.01, %v520_v46 }
 0x166   : > { %v646_v53 = vsel %vm582_vm4, %v464_v39, %v614_v47  ;;  %v662_v54 = vsel %vm598_vm5, %v528_v40, %v630_v48  ;;  %v1191_v55 = vpop.f32.mrb[4].mxu0  ;;  %v1207_v56 = vpop.f32.mrb[4].mxu1 }
 0x167   : > { %v1058_v57 = vpack.c.bf16 %v646_v53, %v645_v43  ;;  %v1098_v58 = vpack.c.bf16 %v662_v54, %v661_v44  ;;  %v644_v59 = vsel %vm580_vm6, %v456_v45, %v612_v49  ;;  %v660_v60 = vsel %vm596_vm7, %v520_v46, %v628_v50  ;;  %v468_v61 = vpop.f32.mrb[5].mxu0  ;;  %v532_v62 = vpop.f32.mrb[5].mxu1 }
 0x168   : > { %v1053_v63 = vpack.c.bf16 %v644_v59, %v643_v51  ;;  %v1093_v0 = vpack.c.bf16 %v660_v60, %v659_v52  ;;  %v477_v1 = vadd.f32 %v1191_v55, %v1725_v24  ;;  %v541_v2 = vadd.f32 %v1207_v56, %v1725_v24  ;;  %v1192_v3 = vpop.f32.mrb[6].mxu0  ;;  %v1208_v4 = vpop.f32.mrb[6].mxu1 }
 0x169   : > { %1130 = vst [vmem:[%s1741_s18 + $0x8] sm:$0xff] %v1058_v57   ;;  %1138 = vst [vmem:[%s1741_s18 + $0x48] sm:$0xff] %v1098_v58   ;;  %v469_v5 = vadd.f32 %v1725_v24, %v468_v61  ;;  %v533_v6 = vadd.f32 %v1725_v24, %v532_v62  ;;  %v480_v7 = vadd.f32 %v1192_v3, %v1725_v24  ;;  %v471_v9 = vpop.f32.mrb[7].mxu0  ;;  %v535_v10 = vpop.f32.mrb[7].mxu1 }
 0x16a   : > { %v544_v8 = vadd.f32 %v1208_v4, %v1725_v24  ;;  %1054 = vst [vmem:[%s1741_s18] sm:$0xff] %v1053_v63   ;;  %1137 = vst [vmem:[%s1741_s18 + $0x40] sm:$0xff] %v1093_v0   ;;  %vm585_vm8 = vcmp.gt.f32.partialorder %v477_v1, 0.0  ;;  %v617_v11 = vmul.f32 0.01, %v477_v1  ;;  %vm601_vm9 = vcmp.gt.f32.partialorder %v541_v2, 0.0 }
 0x16b   : > { %v633_v12 = vmul.f32 0.01, %v541_v2  ;;  %vm583_vm10 = vcmp.gt.f32.partialorder %v469_v5, 0.0  ;;  %v615_v13 = vmul.f32 0.01, %v469_v5  ;;  %vm599_vm11 = vcmp.gt.f32.partialorder %v533_v6, 0.0 }
 0x16c   : > { %v649_v14 = vsel %vm585_vm8, %v477_v1, %v617_v11  ;;  %v631_v15 = vmul.f32 0.01, %v533_v6  ;;  %vm586_vm12 = vcmp.gt.f32.partialorder %v480_v7, 0.0  ;;  %v618_v16 = vmul.f32 0.01, %v480_v7 }
 0x16d   : > { %v665_v17 = vsel %vm601_vm9, %v541_v2, %v633_v12  ;;  %v647_v18 = vsel %vm583_vm10, %v469_v5, %v615_v13  ;;  %vm602_vm13 = vcmp.gt.f32.partialorder %v544_v8, 0.0  ;;  %v634_v19 = vmul.f32 0.01, %v544_v8  ;;  %v1195_v20 = vpop.f32.mrb[8].mxu0  ;;  %v1211_v21 = vpop.f32.mrb[8].mxu1 }
 0x16e   : > { %v650_v22 = vsel %vm586_vm12, %v480_v7, %v618_v16  ;;  %v472_v23 = vadd.f32 %v1725_v24, %v471_v9  ;;  %v536_v25 = vadd.f32 %v1725_v24, %v535_v10  ;;  %v493_v26 = vadd.f32 %v1195_v20, %v1725_v24  ;;  %v484_v27 = vpop.f32.mrb[9].mxu0  ;;  %v548_v28 = vpop.f32.mrb[9].mxu1 }
 0x16f   : > { %v1068_v29 = vpack.c.bf16 %v650_v22, %v649_v14  ;;  %v666_v30 = vsel %vm602_vm13, %v544_v8, %v634_v19  ;;  %v557_v31 = vadd.f32 %v1211_v21, %v1725_v24  ;;  %v485_v32 = vadd.f32 %v1725_v24, %v484_v27  ;;  %v1196_v33 = vpop.f32.mrb[10].mxu0  ;;  %v1212_v34 = vpop.f32.mrb[10].mxu1 }
 0x170   : > { %v1108_v35 = vpack.c.bf16 %v666_v30, %v665_v17  ;;  %vm584_vm14 = vcmp.gt.f32.partialorder %v472_v23, 0.0  ;;  %v616_v36 = vmul.f32 0.01, %v472_v23  ;;  %vm600_vm15 = vcmp.gt.f32.partialorder %v536_v25, 0.0  ;;  %v487_v37 = vpop.f32.mrb[11].mxu0  ;;  %v551_v38 = vpop.f32.mrb[11].mxu1 }
 0x171   : > { %1132 = vst [vmem:[%s1741_s18 + $0x18] sm:$0xff] %v1068_v29   ;;  %v632_v39 = vmul.f32 0.01, %v536_v25  ;;  %vm589_vm0 = vcmp.gt.f32.partialorder %v493_v26, 0.0  ;;  %v621_v40 = vmul.f32 0.01, %v493_v26  ;;  %v663_v41 = vsel %vm599_vm11, %v533_v6, %v631_v15 }
 0x172   : > { %vm605_vm1 = vcmp.gt.f32.partialorder %v557_v31, 0.0  ;;  %1140 = vst [vmem:[%s1741_s18 + $0x58] sm:$0xff] %v1108_v35   ;;  %v648_v42 = vsel %vm584_vm14, %v472_v23, %v616_v36  ;;  %v637_v43 = vmul.f32 0.01, %v557_v31  ;;  %vm587_vm2 = vcmp.gt.f32.partialorder %v485_v32, 0.0 }
 0x173   : > { %v1063_v44 = vpack.c.bf16 %v648_v42, %v647_v18  ;;  %v664_v45 = vsel %vm600_vm15, %v536_v25, %v632_v39  ;;  %v619_v46 = vmul.f32 0.01, %v485_v32  ;;  %v549_v47 = vadd.f32 %v1725_v24, %v548_v28 }
 0x174   : > { %v1103_v48 = vpack.c.bf16 %v664_v45, %v663_v41  ;;  %v653_v49 = vsel %vm589_vm0, %v493_v26, %v621_v40  ;;  %v669_v50 = vsel %vm605_vm1, %v557_v31, %v637_v43  ;;  %v496_v51 = vadd.f32 %v1196_v33, %v1725_v24 }
 0x175   : > { %1131 = vst [vmem:[%s1741_s18 + $0x10] sm:$0xff] %v1063_v44   ;;  %vm603_vm3 = vcmp.gt.f32.partialorder %v549_v47, 0.0  ;;  %v635_v52 = vmul.f32 0.01, %v549_v47  ;;  %v560_v53 = vadd.f32 %v1212_v34, %v1725_v24  ;;  %v488_v54 = vadd.f32 %v1725_v24, %v487_v37  ;;  %v1199_v55 = vpop.f32.mrb[12].mxu0  ;;  %v1215_v56 = vpop.f32.mrb[12].mxu1 }
 0x176   : > { %1139 = vst [vmem:[%s1741_s18 + $0x50] sm:$0xff] %v1103_v48   ;;  %vm590_vm4 = vcmp.gt.f32.partialorder %v496_v51, 0.0  ;;  %v622_v57 = vmul.f32 0.01, %v496_v51  ;;  %v552_v58 = vadd.f32 %v1725_v24, %v551_v38  ;;  %v509_v59 = vadd.f32 %v1199_v55, %v1725_v24  ;;  %v500_v60 = vpop.f32.mrb[13].mxu0  ;;  %v564_v61 = vpop.f32.mrb[13].mxu1 }
 0x177   : > { %v651_v62 = vsel %vm587_vm2, %v485_v32, %v619_v46  ;;  %vm606_vm5 = vcmp.gt.f32.partialorder %v560_v53, 0.0  ;;  %v638_v63 = vmul.f32 0.01, %v560_v53  ;;  %vm588_vm6 = vcmp.gt.f32.partialorder %v488_v54, 0.0  ;;  %v1200_v0 = vpop.f32.mrb[14].mxu0  ;;  %v1216_v1 = vpop.f32.mrb[14].mxu1 }
 0x178   : > { %v654_v2 = vsel %vm590_vm4, %v496_v51, %v622_v57  ;;  %v620_v3 = vmul.f32 0.01, %v488_v54  ;;  %vm604_vm7 = vcmp.gt.f32.partialorder %v552_v58, 0.0  ;;  %v636_v4 = vmul.f32 0.01, %v552_v58  ;;  %v503_v5 = vpop.f32.mrb[15].mxu0 }
 0x179   : > { %v667_v6 = vsel %vm603_vm3, %v549_v47, %v635_v52  ;;  %v1078_v7 = vpack.c.bf16 %v654_v2, %v653_v49  ;;  %v670_v8 = vsel %vm606_vm5, %v560_v53, %v638_v63  ;;  %v625_v9 = vmul.f32 0.01, %v509_v59  ;;  %v567_v10 = vpop.f32.mrb[15].mxu1 }
 0x17a   : > { %v1118_v11 = vpack.c.bf16 %v670_v8, %v669_v50  ;;  %v652_v12 = vsel %vm588_vm6, %v488_v54, %v620_v3  ;;  %v668_v13 = vsel %vm604_vm7, %v552_v58, %v636_v4  ;;  %v573_v14 = vadd.f32 %v1215_v56, %v1725_v24 }
 0x17b   : > { %1134 = vst [vmem:[%s1741_s18 + $0x28] sm:$0xff] %v1078_v7   ;;  %v1073_v15 = vpack.c.bf16 %v652_v12, %v651_v62  ;;  %v1113_v16 = vpack.c.bf16 %v668_v13, %v667_v6  ;;  %vm593_vm8 = vcmp.gt.f32.partialorder %v509_v59, 0.0  ;;  %v501_v17 = vadd.f32 %v1725_v24, %v500_v60 }
 0x17c   : > { %1142 = vst [vmem:[%s1741_s18 + $0x68] sm:$0xff] %v1118_v11   ;;  %vm609_vm9 = vcmp.gt.f32.partialorder %v573_v14, 0.0  ;;  %v641_v18 = vmul.f32 0.01, %v573_v14  ;;  %v565_v19 = vadd.f32 %v1725_v24, %v564_v61  ;;  %v512_v20 = vadd.f32 %v1200_v0, %v1725_v24 }
 0x17d   : > { %1133 = vst [vmem:[%s1741_s18 + $0x20] sm:$0xff] %v1073_v15   ;;  %1141 = vst [vmem:[%s1741_s18 + $0x60] sm:$0xff] %v1113_v16   ;;  %v623_v21 = vmul.f32 0.01, %v501_v17  ;;  %v576_v22 = vadd.f32 %v1216_v1, %v1725_v24  ;;  %v504_v23 = vadd.f32 %v1725_v24, %v503_v5  ;;  %v657_v25 = vsel %vm593_vm8, %v509_v59, %v625_v9 }
 0x17e   : > { %vm591_vm10 = vcmp.gt.f32.partialorder %v501_v17, 0.0  ;;  %vm594_vm11 = vcmp.gt.f32.partialorder %v512_v20, 0.0  ;;  %v673_v26 = vsel %vm609_vm9, %v573_v14, %v641_v18  ;;  %v626_v27 = vmul.f32 0.01, %v512_v20 }
 0x17f   : > { %vm610_vm12 = vcmp.gt.f32.partialorder %v576_v22, 0.0  ;;  %v642_v28 = vmul.f32 0.01, %v576_v22  ;;  %vm607_vm13 = vcmp.gt.f32.partialorder %v565_v19, 0.0  ;;  %vm592_vm14 = vcmp.gt.f32.partialorder %v504_v23, 0.0 }
 0x180   : > { %v624_v29 = vmul.f32 0.01, %v504_v23  ;;  %v568_v30 = vadd.f32 %v1725_v24, %v567_v10  ;;  %v655_v31 = vsel %vm591_vm10, %v501_v17, %v623_v21  ;;  %v639_v32 = vmul.f32 0.01, %v565_v19 }
 0x181   : > { %v658_v33 = vsel %vm594_vm11, %v512_v20, %v626_v27  ;;  %v674_v34 = vsel %vm610_vm12, %v576_v22, %v642_v28 }
 0x182   : > { %v1088_v35 = vpack.c.bf16 %v658_v33, %v657_v25  ;;  %v1128_v36 = vpack.c.bf16 %v674_v34, %v673_v26  ;;  %v656_v37 = vsel %vm592_vm14, %v504_v23, %v624_v29  ;;  %vm608_vm15 = vcmp.gt.f32.partialorder %v568_v30, 0.0 }
 0x183   : > { %v1083_v38 = vpack.c.bf16 %v656_v37, %v655_v31  ;;  %v640_v39 = vmul.f32 0.01, %v568_v30  ;;  %v671_v24 = vsel %vm607_vm13, %v565_v19, %v639_v32 }
 0x184   : > { %1136 = vst [vmem:[%s1741_s18 + $0x38] sm:$0xff] %v1088_v35   ;;  %1144 = vst [vmem:[%s1741_s18 + $0x78] sm:$0xff] %v1128_v36  }
 0x185   : > { %1135 = vst [vmem:[%s1741_s18 + $0x30] sm:$0xff] %v1083_v38   ;;  %v672_v40 = vsel %vm608_vm15, %v568_v30, %v640_v39 }
 0x186   : > { %v1123_v41 = vpack.c.bf16 %v672_v40, %v671_v24 }
 0x188   : > { %1143 = vst [vmem:[%s1741_s18 + $0x70] sm:$0xff] %v1123_v41  }
 0x189   : > { %1427 = shalt.err (!%p1424_p1)
}
 0x18a   : > { %s1428_s11 = scalar_lea.hbm %s1789_s28, 2048  ;;  %s1432_s27 = scalar_lea.hbm %s1839_s3, 4096 }
 0x18b   : > { %p1429_p13 = scmp.ne.s32.totalorder %s1789_s28, %s1428_s11  ;;  %p1433_p4 = scmp.lt.u32.totalorder %s1789_s28, %s1839_s3 }
 0x18c   : > { %p1434_p5 = scmp.lt.u32.totalorder %s1432_s27, %s1428_s11  ;;  %p1436_p11 = scmp.lt.u32.totalorder %s1428_s11, %s1789_s28 }
 0x18d   : > { %p1430_p6 = pnand %p1429_p13, %p1853_p0 }
 0x18e   : > { %p1435_p8 = por %p1434_p5, %p1433_p4 }
 0x18f   : > { %p1431_p10 = pneg %p1430_p6 }
 0x190   : > { %p1437_p2 = por %p1436_p11, %p1435_p8 }
 0x192   : > { %p1438_p3 = pnand %p1437_p2, %p1431_p10 }
 0x194   : > { %1441 = shalt.err (!%p1438_p3)
}
 0x195   : > { %s1492_s22 = smov 64   ;;  %s1493_s18 = smov 4  }
 0x196   : > { %1243 = dma.vmem_to_hbm [thread:$0]  (%p1853_p0), %s1791_s7, 2048, %s1789_s28, %s836_s16, %s1492_s22, %s1492_s22, %s1493_s18  }
 0x197 PF: > { %s864_s20 = sand.u32 1, %s1472_s12   ;;  %p1854_p7 = scmp.ne.s32.totalorder %s1844_s19, 0 }
 0x198   : > { %p1855_p9 = scmp.ge.s32.totalorder %s1484_s15, 2  ;;  %s865_s8 = scalar_lea.sflag [#allocation4], %s864_s20 }
 0x19a   : > { %p1257_p12 = pnand %p1855_p9, %p1854_p7 }
 0x19c   : > { %1467 = dma.done.wait (!%p1257_p12), %s865_s8, 2048  }
 0x19d   : > { %1469 = vsyncadd (!%p1257_p12), %s865_s8, 4294965248  ;;  %p17_p1 = scmp.ge.s32.totalorder %s1628_s5, 4   ;;  %s1856_s12 = smov %s1476_s13 }
 0x19e   : > { %s1857_s13 = smov %s1480_s14  ;;  %s1858_s14 = smov %s1644_s10 }
 0x19f   : > { %s1859_s15 = smov %s1628_s5  ;;  %19 = sbr.rel (!%p17_p1) target bundleno = 6 (0x6), region = 85 }
 0x1a6   :  { %870 = vsyncpa [#allocation3], 1 }
 0x1a7   :  { %872 = vsyncpa [#allocation3 + $0x1], 1 }
 0x1a8   :  { %873 = vsyncpa [#allocation6], 1 }
 0x1a9   :  { %874 = vsyncpa [#allocation4], 1 }
 0x1aa   :  { %876 = vsyncpa [#allocation4 + $0x1], 1 }

// kernel: _lambda_.6
= control target key start
LH: loop header
LB: loop body
LE: loop exit
PB: predicated region body
PF: predicated region fallthrough
CT: control target
= control target key end

     0   :  { %8 = vsyncpa [#allocation3], 0  ;;  %s821_s0 = inlined_call_operand.hbm [shape: bf16[128,128], index: 0, kind: input, shape index: {}]   ;;  %s822_s1 = inlined_call_operand.hbm [shape: bf16[128,128], index: 1, kind: input, shape index: {}]   ;;  %s823_s2 = inlined_call_operand.hbm [shape: f32[1,128], index: 2, kind: input, shape index: {}]   ;;  %s824_s3 = inlined_call_operand.hbm [shape: bf16[128,128], index: 3, kind: output, shape index: {}]  }
   0x1   :  { %9 = vsyncpa [#allocation6], 0 }
   0x2   :  { %10 = vsyncpa [#allocation4], 0  ;;  %s709_s12 = smov [#allocation5]   ;;  %s710_s14 = smov [#allocation2]  }
   0x3   :  { %s28_s13 = sshll.u32 %s709_s12, 4  ;;  %s16_s15 = sshll.u32 %s710_s14, 4  ;;  %s29_s13 = int_to_ptr.vmem [resolvable:$true] %s28_s13  ;;  %s735_s15 = int_to_ptr.vmem [resolvable:$true] %s16_s15 }
   0x4   :  { %s615_s18 = scalar_lea.hbm %s822_s1, 1024 }
   0x5   :  { %p616_p0 = scmp.ne.s32.totalorder %s822_s1, %s615_s18  ;;  %p619_p1 = scmp.lt.u32.totalorder %s615_s18, %s822_s1 }
   0x7   :  { %p621_p2 = pnand %p619_p1, %p616_p0 }
   0x9   :  { %624 = shalt.err (!%p621_p2)
}
   0xa   :  { %s625_s23 = scalar_lea.vmem %s29_s13, 1024  ;;  %p630_p4 = scmp.lt.s32.totalorder %s29_s13, %s29_s13 }
   0xb   :  { %p626_p3 = scmp.ne.s32.totalorder %s29_s13, %s625_s23  ;;  %p631_p5 = scmp.lt.s32.totalorder %s625_s23, %s625_s23 }
   0xd   :  { %p632_p6 = por %p631_p5, %p630_p4 }
   0xf   :  { %p633_p7 = pnand %p632_p6, %p626_p3 }
  0x11   :  { %636 = shalt.err (!%p633_p7)
}
  0x12   :  { %s711_s24 = smov 64   ;;  %s712_s25 = smov 4  }
  0x13   :  { %34 = dma.hbm_to_vmem [thread:$0]  %s822_s1, 1024, %s29_s13, [#allocation6], %s711_s24, %s711_s24, %s712_s25  }
  0x14   :  { %s637_s30 = scalar_lea.hbm %s821_s0, 1024 }
  0x15   :  { %p638_p8 = scmp.ne.s32.totalorder %s821_s0, %s637_s30  ;;  %p641_p9 = scmp.lt.u32.totalorder %s637_s30, %s821_s0 }
  0x17   :  { %p643_p10 = pnand %p641_p9, %p638_p8 }
  0x19   :  { %646 = shalt.err (!%p643_p10)
}
  0x1a   :  { %s647_s8 = scalar_lea.vmem %s735_s15, 1024  ;;  %p652_p12 = scmp.lt.s32.totalorder %s735_s15, %s735_s15 }
  0x1b   :  { %p648_p11 = scmp.ne.s32.totalorder %s735_s15, %s647_s8  ;;  %p653_p13 = scmp.lt.s32.totalorder %s647_s8, %s647_s8 }
  0x1d   :  { %p654_p0 = por %p653_p13, %p652_p12 }
  0x1f   :  { %p655_p1 = pnand %p654_p0, %p648_p11 }
  0x21   :  { %658 = shalt.err (!%p655_p1)
}
  0x22   :  { %22 = dma.hbm_to_vmem [thread:$0]  %s821_s0, 1024, %s735_s15, [#allocation3], %s711_s24, %s711_s24, %s712_s25  }
  0x23   :  { %s713_s10 = smov [#allocation7]   ;;  %s659_s14 = scalar_lea.hbm %s823_s2, 16 }
  0x24   :  { %s41_s11 = sshll.u32 %s713_s10, 4  ;;  %p660_p2 = scmp.ne.s32.totalorder %s823_s2, %s659_s14  ;;  %s42_s11 = int_to_ptr.vmem [resolvable:$true] %s41_s11 }
  0x25   :  { %p663_p3 = scmp.lt.u32.totalorder %s659_s14, %s823_s2 }
  0x27   :  { %p665_p4 = pnand %p663_p3, %p660_p2 }
  0x29   :  { %668 = shalt.err (!%p665_p4)
}
  0x2a   :  { %s669_s20 = scalar_lea.vmem %s42_s11, 16  ;;  %s673_s0 = scalar_lea.vmem %s42_s11, 32 }
  0x2b   :  { %p670_p5 = scmp.ne.s32.totalorder %s42_s11, %s669_s20  ;;  %p674_p6 = scmp.lt.s32.totalorder %s42_s11, %s42_s11 }
  0x2c   :  { %p675_p7 = scmp.lt.s32.totalorder %s673_s0, %s669_s20 }
  0x2e   :  { %p676_p8 = por %p675_p7, %p674_p6 }
  0x30   :  { %p677_p9 = pnand %p676_p8, %p670_p5 }
  0x32   :  { %680 = shalt.err (!%p677_p9)
}
  0x33   :  { %44 = dma.hbm_to_vmem [thread:$0]  %s823_s2, 16, %s42_s11, [#allocation6]  }
  0x34   :  { %703 = dma.done.wait [#allocation3], 1024  }
  0x35   :  { %704 = vsyncadd [#allocation3], 4294966272 }
  0x36   :  { %705 = dma.done.wait [#allocation6], 1040  }
  0x37   :  { %706 = vsyncadd [#allocation6], 4294966256  ;;  %v599_v0 = vld [vmem:[#allocation5] sm:$0xff]   ;;  %v600_v1 = vld [vmem:[#allocation5 + $0x8] sm:$0xff]   ;;  %s714_s2 = smov [#allocation8]  }
  0x38   :  { %545 = vmatprep.subr.bf16.mxu0 %v599_v0  ;;  %577 = vmatprep.subr.bf16.mxu1 %v599_v0  ;;  %v601_v2 = vld [vmem:[#allocation5 + $0x10] sm:$0xff]   ;;  %v602_v3 = vld [vmem:[#allocation5 + $0x18] sm:$0xff]   ;;  %v607_v4 = vld [vmem:[#allocation2] sm:$0xff]   ;;  %s420_s22 = sshll.u32 %s714_s2, 4  ;;  %s421_s22 = int_to_ptr.vmem [resolvable:$true] %s420_s22 }
  0x39   :  { %546 = vmatpush3.bf16.msra.mxu0 %v599_v0  ;;  %585 = vmatpush3.bf16.msra.mxu1 %v599_v0  ;;  %v608_v5 = vld [vmem:[#allocation2 + $0x20] sm:$0xff]   ;;  %v604_v7 = vld [vmem:[#allocation5 + $0x28] sm:$0xff]   ;;  %v605_v8 = vld [vmem:[#allocation5 + $0x30] sm:$0xff]   ;;  %s681_s23 = scalar_lea.vmem %s421_s22, 1024  ;;  %p686_p11 = scmp.lt.s32.totalorder %s421_s22, %s421_s22 }
  0x3a   :  { %547 = vmatprep.subr.bf16.mxu0 %v600_v1  ;;  %578 = vmatprep.subr.bf16.mxu1 %v600_v1  ;;  %v603_v6 = vld [vmem:[#allocation5 + $0x20] sm:$0xff]   ;;  %v606_v9 = vld [vmem:[#allocation5 + $0x38] sm:$0xff]   ;;  %v609_v10 = vld [vmem:[#allocation2 + $0x8] sm:$0xff]   ;;  %p682_p10 = scmp.ne.s32.totalorder %s421_s22, %s681_s23  ;;  %p687_p12 = scmp.lt.s32.totalorder %s681_s23, %s681_s23 }
  0x3b   :  { %561 = vmatprep.mubr.bf16.mxu0 %v607_v4  ;;  %569 = vmatprep.mubr.bf16.mxu1 %v608_v5  ;;  %v610_v11 = vld [vmem:[#allocation2 + $0x28] sm:$0xff]   ;;  %v611_v12 = vld [vmem:[#allocation2 + $0x10] sm:$0xff]   ;;  %v613_v14 = vld [vmem:[#allocation2 + $0x18] sm:$0xff]  }
  0x3c   :  { %v612_v13 = vld [vmem:[#allocation2 + $0x30] sm:$0xff]   ;;  %v614_v15 = vld [vmem:[#allocation2 + $0x38] sm:$0xff]   ;;  %v784_v16 = vld [vmem:[#allocation7] ss:$0 sm:$0xff]  ;;  %p688_p13 = por %p687_p12, %p686_p11 }
  0x3d   :  { %548 = vmatpush3.bf16.msra.mxu0 %v600_v1  ;;  %586 = vmatpush3.bf16.msra.mxu1 %v600_v1 }
  0x3e   :  { %549 = vmatprep.subr.bf16.mxu0 %v601_v2  ;;  %579 = vmatprep.subr.bf16.mxu1 %v601_v2  ;;  %p689_p0 = pnand %p688_p13, %p682_p10 }
  0x41   :  { %550 = vmatpush3.bf16.msra.mxu0 %v601_v2  ;;  %587 = vmatpush3.bf16.msra.mxu1 %v601_v2 }
  0x42   :  { %551 = vmatprep.subr.bf16.mxu0 %v602_v3  ;;  %580 = vmatprep.subr.bf16.mxu1 %v602_v3 }
  0x45   :  { %552 = vmatpush3.bf16.msra.mxu0 %v602_v3  ;;  %588 = vmatpush3.bf16.msra.mxu1 %v602_v3 }
  0x46   :  { %553 = vmatprep.subr.bf16.mxu0 %v603_v6  ;;  %581 = vmatprep.subr.bf16.mxu1 %v603_v6 }
  0x49   :  { %554 = vmatpush3.bf16.msra.mxu0 %v603_v6  ;;  %589 = vmatpush3.bf16.msra.mxu1 %v603_v6 }
  0x4a   :  { %555 = vmatprep.subr.bf16.mxu0 %v604_v7  ;;  %582 = vmatprep.subr.bf16.mxu1 %v604_v7 }
  0x4d   :  { %556 = vmatpush3.bf16.msra.mxu0 %v604_v7  ;;  %590 = vmatpush3.bf16.msra.mxu1 %v604_v7 }
  0x4e   :  { %557 = vmatprep.subr.bf16.mxu0 %v605_v8  ;;  %583 = vmatprep.subr.bf16.mxu1 %v605_v8 }
  0x51   :  { %558 = vmatpush3.bf16.msra.mxu0 %v605_v8  ;;  %591 = vmatpush3.bf16.msra.mxu1 %v605_v8 }
  0x52   :  { %559 = vmatprep.subr.bf16.mxu0 %v606_v9  ;;  %584 = vmatprep.subr.bf16.mxu1 %v606_v9 }
  0x55   :  { %560 = vmatpush3.bf16.msra.mxu0 %v606_v9  ;;  %592 = vmatpush3.bf16.msra.mxu1 %v606_v9 }
  0x58   :  { %562 = vmatmul.mubr.bf16.vlgmr.msra.gmra.mrb[0].mxu0 %v609_v10  ;;  %570 = vmatmul.mubr.bf16.vlgmr.msra.gmra.mrb[0].mxu1 %v610_v11 }
  0x59   :  { %565 = vmatprep.mubr.bf16.mxu0 %v611_v12  ;;  %573 = vmatprep.mubr.bf16.mxu1 %v612_v13 }
  0x60   :  { %566 = vmatmul.mubr.bf16.gmra.mrb[4].mxu0 %v613_v14  ;;  %574 = vmatmul.mubr.bf16.gmra.mrb[4].mxu1 %v614_v15 }
 0x12b   :  { %v563_v17 = vpop.f32.mrb[0].mxu0  ;;  %v571_v18 = vpop.f32.mrb[0].mxu1 }
 0x12c   :  { %v233_v19 = vadd.f32 %v563_v17, %v784_v16  ;;  %v265_v20 = vadd.f32 %v571_v18, %v784_v16  ;;  %v224_v21 = vpop.f32.mrb[1].mxu0  ;;  %v256_v22 = vpop.f32.mrb[1].mxu1 }
 0x12d   :  { %v225_v23 = vadd.f32 %v784_v16, %v224_v21  ;;  %v257_v24 = vadd.f32 %v784_v16, %v256_v22  ;;  %v564_v25 = vpop.f32.mrb[2].mxu0  ;;  %v572_v26 = vpop.f32.mrb[2].mxu1 }
 0x12e   :  { %vm289_vm0 = vcmp.gt.f32.partialorder %v233_v19, 0.0  ;;  %v305_v27 = vmul.f32 0.01, %v233_v19  ;;  %vm297_vm1 = vcmp.gt.f32.partialorder %v265_v20, 0.0  ;;  %v313_v28 = vmul.f32 0.01, %v265_v20 }
 0x12f   :  { %vm287_vm2 = vcmp.gt.f32.partialorder %v225_v23, 0.0  ;;  %v303_v29 = vmul.f32 0.01, %v225_v23  ;;  %vm295_vm3 = vcmp.gt.f32.partialorder %v257_v24, 0.0  ;;  %v311_v30 = vmul.f32 0.01, %v257_v24 }
 0x130   :  { %v236_v31 = vadd.f32 %v564_v25, %v784_v16  ;;  %v268_v32 = vadd.f32 %v572_v26, %v784_v16  ;;  %v227_v33 = vpop.f32.mrb[3].mxu0  ;;  %v259_v34 = vpop.f32.mrb[3].mxu1  ;;  %v321_v35 = vsel %vm289_vm0, %v233_v19, %v305_v27  ;;  %v329_v36 = vsel %vm297_vm1, %v265_v20, %v313_v28 }
 0x131   :  { %v228_v37 = vadd.f32 %v784_v16, %v227_v33  ;;  %v260_v38 = vadd.f32 %v784_v16, %v259_v34  ;;  %v319_v43 = vsel %vm287_vm2, %v225_v23, %v303_v29  ;;  %v327_v44 = vsel %vm295_vm3, %v257_v24, %v311_v30 }
 0x132   :  { %vm290_vm4 = vcmp.gt.f32.partialorder %v236_v31, 0.0  ;;  %v306_v39 = vmul.f32 0.01, %v236_v31  ;;  %vm298_vm5 = vcmp.gt.f32.partialorder %v268_v32, 0.0  ;;  %v314_v40 = vmul.f32 0.01, %v268_v32 }
 0x133   :  { %vm288_vm6 = vcmp.gt.f32.partialorder %v228_v37, 0.0  ;;  %v304_v41 = vmul.f32 0.01, %v228_v37  ;;  %vm296_vm7 = vcmp.gt.f32.partialorder %v260_v38, 0.0  ;;  %v312_v42 = vmul.f32 0.01, %v260_v38 }
 0x134   :  { %v322_v45 = vsel %vm290_vm4, %v236_v31, %v306_v39  ;;  %v330_v46 = vsel %vm298_vm5, %v268_v32, %v314_v40  ;;  %v567_v47 = vpop.f32.mrb[4].mxu0  ;;  %v575_v48 = vpop.f32.mrb[4].mxu1 }
 0x135   :  { %v490_v49 = vpack.c.bf16 %v322_v45, %v321_v35  ;;  %v510_v50 = vpack.c.bf16 %v330_v46, %v329_v36  ;;  %v320_v51 = vsel %vm288_vm6, %v228_v37, %v304_v41  ;;  %v328_v52 = vsel %vm296_vm7, %v260_v38, %v312_v42  ;;  %v240_v53 = vpop.f32.mrb[5].mxu0  ;;  %v272_v54 = vpop.f32.mrb[5].mxu1 }
 0x136   :  { %v485_v55 = vpack.c.bf16 %v320_v51, %v319_v43  ;;  %v505_v56 = vpack.c.bf16 %v328_v52, %v327_v44  ;;  %v249_v57 = vadd.f32 %v567_v47, %v784_v16  ;;  %v281_v58 = vadd.f32 %v575_v48, %v784_v16  ;;  %v568_v59 = vpop.f32.mrb[6].mxu0  ;;  %v576_v60 = vpop.f32.mrb[6].mxu1 }
 0x137   :  { %522 = vst [vmem:[#allocation8 + $0x8] sm:$0xff] %v490_v49   ;;  %526 = vst [vmem:[#allocation8 + $0x28] sm:$0xff] %v510_v50   ;;  %v241_v61 = vadd.f32 %v784_v16, %v240_v53  ;;  %v273_v62 = vadd.f32 %v784_v16, %v272_v54  ;;  %v252_v63 = vadd.f32 %v568_v59, %v784_v16  ;;  %v243_v1 = vpop.f32.mrb[7].mxu0  ;;  %v275_v2 = vpop.f32.mrb[7].mxu1 }
 0x138   :  { %v284_v0 = vadd.f32 %v576_v60, %v784_v16  ;;  %486 = vst [vmem:[#allocation8] sm:$0xff] %v485_v55   ;;  %525 = vst [vmem:[#allocation8 + $0x20] sm:$0xff] %v505_v56   ;;  %v309_v3 = vmul.f32 0.01, %v249_v57  ;;  %vm293_vm8 = vcmp.gt.f32.partialorder %v249_v57, 0.0  ;;  %vm301_vm9 = vcmp.gt.f32.partialorder %v281_v58, 0.0 }
 0x139   :  { %v317_v4 = vmul.f32 0.01, %v281_v58  ;;  %vm291_vm10 = vcmp.gt.f32.partialorder %v241_v61, 0.0  ;;  %vm294_vm11 = vcmp.gt.f32.partialorder %v252_v63, 0.0  ;;  %v310_v5 = vmul.f32 0.01, %v252_v63 }
 0x13a   :  { %v307_v6 = vmul.f32 0.01, %v241_v61  ;;  %vm299_vm12 = vcmp.gt.f32.partialorder %v273_v62, 0.0  ;;  %vm302_vm13 = vcmp.gt.f32.partialorder %v284_v0, 0.0  ;;  %v318_v7 = vmul.f32 0.01, %v284_v0 }
 0x13b   :  { %v325_v8 = vsel %vm293_vm8, %v249_v57, %v309_v3  ;;  %v326_v9 = vsel %vm294_vm11, %v252_v63, %v310_v5  ;;  %v244_v10 = vadd.f32 %v784_v16, %v243_v1  ;;  %v276_v11 = vadd.f32 %v784_v16, %v275_v2 }
 0x13c   :  { %v333_v12 = vsel %vm301_vm9, %v281_v58, %v317_v4  ;;  %v315_v13 = vmul.f32 0.01, %v273_v62  ;;  %v500_v14 = vpack.c.bf16 %v326_v9, %v325_v8  ;;  %v334_v15 = vsel %vm302_vm13, %v284_v0, %v318_v7 }
 0x13d   :  { %v520_v17 = vpack.c.bf16 %v334_v15, %v333_v12  ;;  %vm292_vm14 = vcmp.gt.f32.partialorder %v244_v10, 0.0  ;;  %v308_v18 = vmul.f32 0.01, %v244_v10  ;;  %vm300_vm15 = vcmp.gt.f32.partialorder %v276_v11, 0.0 }
 0x13e   :  { %524 = vst [vmem:[#allocation8 + $0x18] sm:$0xff] %v500_v14   ;;  %v316_v19 = vmul.f32 0.01, %v276_v11  ;;  %v323_v20 = vsel %vm291_vm10, %v241_v61, %v307_v6  ;;  %v331_v22 = vsel %vm299_vm12, %v273_v62, %v315_v13 }
 0x13f   :  { %528 = vst [vmem:[#allocation8 + $0x38] sm:$0xff] %v520_v17   ;;  %v324_v21 = vsel %vm292_vm14, %v244_v10, %v308_v18 }
 0x140   :  { %v495_v23 = vpack.c.bf16 %v324_v21, %v323_v20  ;;  %v332_v16 = vsel %vm300_vm15, %v276_v11, %v316_v19 }
 0x141   :  { %v515_v24 = vpack.c.bf16 %v332_v16, %v331_v22 }
 0x142   :  { %523 = vst [vmem:[#allocation8 + $0x10] sm:$0xff] %v495_v23  }
 0x143   :  { %527 = vst [vmem:[#allocation8 + $0x30] sm:$0xff] %v515_v24  }
 0x144   :  { %692 = shalt.err (!%p689_p0)
}
 0x145   :  { %s693_s28 = scalar_lea.hbm %s824_s3, 1024 }
 0x146   :  { %p694_p1 = scmp.ne.s32.totalorder %s824_s3, %s693_s28  ;;  %p697_p2 = scmp.lt.u32.totalorder %s693_s28, %s824_s3 }
 0x148   :  { %p699_p3 = pnand %p697_p2, %p694_p1 }
 0x14a   :  { %702 = shalt.err (!%p699_p3)
}
 0x14b   :  { %426 = dma.vmem_to_hbm [thread:$0]  %s421_s22, 1024, %s824_s3, [#allocation4], %s711_s24, %s711_s24, %s712_s25  }
 0x14c   :  { %707 = dma.done.wait [#allocation4], 1024  }
 0x14d   :  { %708 = vsyncadd [#allocation4], 4294966272 }
 0x14e   :  { %430 = vsyncpa [#allocation3], 1 }
 0x14f   :  { %431 = vsyncpa [#allocation6], 1 }
 0x150   :  { %432 = vsyncpa [#allocation4], 1 }

// kernel: _lambda_.7
= control target key start
LH: loop header
LB: loop body
LE: loop exit
PB: predicated region body
PF: predicated region fallthrough
CT: control target
= control target key end

     0   :  { %8 = vsyncpa [#allocation3], 0  ;;  %s603_s0 = inlined_call_operand.hbm [shape: bf16[32,256], index: 0, kind: input, shape index: {}]   ;;  %s604_s1 = inlined_call_operand.hbm [shape: bf16[256,128], index: 1, kind: input, shape index: {}]   ;;  %s605_s2 = inlined_call_operand.hbm [shape: f32[1,128], index: 2, kind: input, shape index: {}]   ;;  %s606_s3 = inlined_call_operand.hbm [shape: bf16[32,128], index: 3, kind: output, shape index: {}]  }
   0x1   :  { %9 = vsyncpa [#allocation6], 0 }
   0x2   :  { %10 = vsyncpa [#allocation4], 0  ;;  %s521_s12 = smov [#allocation5]   ;;  %s427_s16 = scalar_lea.hbm %s604_s1, 2048 }
   0x3   :  { %s28_s13 = sshll.u32 %s521_s12, 4  ;;  %p428_p0 = scmp.ne.s32.totalorder %s604_s1, %s427_s16  ;;  %s29_s13 = int_to_ptr.vmem [resolvable:$true] %s28_s13 }
   0x4   :  { %p431_p1 = scmp.lt.u32.totalorder %s427_s16, %s604_s1 }
   0x6   :  { %p433_p2 = pnand %p431_p1, %p428_p0 }
   0x8   :  { %436 = shalt.err (!%p433_p2)
}
   0x9   :  { %s437_s21 = scalar_lea.vmem %s29_s13, 2048  ;;  %p442_p4 = scmp.lt.s32.totalorder %s29_s13, %s29_s13 }
   0xa   :  { %p438_p3 = scmp.ne.s32.totalorder %s29_s13, %s437_s21  ;;  %p443_p5 = scmp.lt.s32.totalorder %s437_s21, %s437_s21 }
   0xc   :  { %p444_p6 = por %p443_p5, %p442_p4 }
   0xe   :  { %p445_p7 = pnand %p444_p6, %p438_p3 }
  0x10   :  { %448 = shalt.err (!%p445_p7)
}
  0x11   :  { %s522_s22 = smov 64   ;;  %s523_s23 = smov 4  }
  0x12   :  { %34 = dma.hbm_to_vmem [thread:$0]  %s604_s1, 2048, %s29_s13, [#allocation6], %s522_s22, %s522_s22, %s523_s23  }
  0x13   :  { %s524_s26 = smov [#allocation2]   ;;  %s449_s30 = scalar_lea.hbm %s603_s0, 512 }
  0x14   :  { %s16_s27 = sshll.u32 %s524_s26, 4  ;;  %p450_p8 = scmp.ne.s32.totalorder %s603_s0, %s449_s30  ;;  %s17_s27 = int_to_ptr.vmem [resolvable:$true] %s16_s27 }
  0x15   :  { %p453_p9 = scmp.lt.u32.totalorder %s449_s30, %s603_s0 }
  0x17   :  { %p455_p10 = pnand %p453_p9, %p450_p8 }
  0x19   :  { %458 = shalt.err (!%p455_p10)
}
  0x1a   :  { %s459_s8 = scalar_lea.vmem %s17_s27, 512  ;;  %p464_p12 = scmp.lt.s32.totalorder %s17_s27, %s17_s27 }
  0x1b   :  { %p460_p11 = scmp.ne.s32.totalorder %s17_s27, %s459_s8  ;;  %p465_p13 = scmp.lt.s32.totalorder %s459_s8, %s459_s8 }
  0x1d   :  { %p466_p0 = por %p465_p13, %p464_p12 }
  0x1f   :  { %p467_p1 = pnand %p466_p0, %p460_p11 }
  0x21   :  { %470 = shalt.err (!%p467_p1)
}
  0x22   :  { %s525_s1 = smov 128   ;;  %s526_s9 = smov 8  }
  0x23   :  { %22 = dma.hbm_to_vmem [thread:$0]  %s603_s0, 512, %s17_s27, [#allocation3], %s525_s1, %s525_s1, %s526_s9  }
  0x24   :  { %s527_s12 = smov [#allocation7]   ;;  %s471_s16 = scalar_lea.hbm %s605_s2, 16 }
  0x25   :  { %s41_s13 = sshll.u32 %s527_s12, 4  ;;  %p472_p2 = scmp.ne.s32.totalorder %s605_s2, %s471_s16  ;;  %s42_s13 = int_to_ptr.vmem [resolvable:$true] %s41_s13 }
  0x26   :  { %p475_p3 = scmp.lt.u32.totalorder %s471_s16, %s605_s2 }
  0x28   :  { %p477_p4 = pnand %p475_p3, %p472_p2 }
  0x2a   :  { %480 = shalt.err (!%p477_p4)
}
  0x2b   :  { %s481_s21 = scalar_lea.vmem %s42_s13, 16  ;;  %s485_s0 = scalar_lea.vmem %s42_s13, 32 }
  0x2c   :  { %p482_p5 = scmp.ne.s32.totalorder %s42_s13, %s481_s21  ;;  %p486_p6 = scmp.lt.s32.totalorder %s42_s13, %s42_s13 }
  0x2d   :  { %p487_p7 = scmp.lt.s32.totalorder %s485_s0, %s481_s21 }
  0x2f   :  { %p488_p8 = por %p487_p7, %p486_p6 }
  0x31   :  { %p489_p9 = pnand %p488_p8, %p482_p5 }
  0x33   :  { %492 = shalt.err (!%p489_p9)
}
  0x34   :  { %44 = dma.hbm_to_vmem [thread:$0]  %s605_s2, 16, %s42_s13, [#allocation6]  }
  0x35   :  { %515 = dma.done.wait [#allocation3], 512  }
  0x36   :  { %516 = vsyncadd [#allocation3], 4294966784 }
  0x37   :  { %517 = dma.done.wait [#allocation6], 2064  }
  0x38   :  { %518 = vsyncadd [#allocation6], 4294965232  ;;  %v405_v0 = vld [vmem:[#allocation5 + $0x40] sm:$0xff]   ;;  %v407_v2 = vld [vmem:[#allocation5 + $0x48] sm:$0xff]   ;;  %s528_s2 = smov [#allocation8]  }
  0x39   :  { %v406_v1 = vld [vmem:[#allocation5] sm:$0xff]   ;;  %353 = vmatprep.subr.bf16.mxu0 %v405_v0  ;;  %381 = vmatprep.subr.bf16.mxu1 %v405_v0  ;;  %v408_v3 = vld [vmem:[#allocation5 + $0x8] sm:$0xff]   ;;  %v409_v4 = vld [vmem:[#allocation5 + $0x50] sm:$0xff]   ;;  %s300_s26 = sshll.u32 %s528_s2, 4  ;;  %s301_s26 = int_to_ptr.vmem [resolvable:$true] %s300_s26 }
  0x3a   :  { %354 = vmatpush3.bf16.msra.mxu0 %v406_v1  ;;  %389 = vmatpush3.bf16.msra.mxu1 %v406_v1  ;;  %v410_v5 = vld [vmem:[#allocation5 + $0x10] sm:$0xff]   ;;  %v411_v6 = vld [vmem:[#allocation5 + $0x58] sm:$0xff]   ;;  %v413_v8 = vld [vmem:[#allocation5 + $0x60] sm:$0xff]   ;;  %s493_s27 = scalar_lea.vmem %s301_s26, 256  ;;  %p498_p11 = scmp.lt.s32.totalorder %s301_s26, %s301_s26 }
  0x3b   :  { %355 = vmatprep.subr.bf16.mxu0 %v407_v2  ;;  %382 = vmatprep.subr.bf16.mxu1 %v407_v2  ;;  %v412_v7 = vld [vmem:[#allocation5 + $0x18] sm:$0xff]   ;;  %v414_v9 = vld [vmem:[#allocation5 + $0x20] sm:$0xff]   ;;  %v415_v10 = vld [vmem:[#allocation5 + $0x68] sm:$0xff]   ;;  %p494_p10 = scmp.ne.s32.totalorder %s301_s26, %s493_s27  ;;  %p499_p12 = scmp.lt.s32.totalorder %s493_s27, %s493_s27 }
  0x3c   :  { %v423_v11 = vld [vmem:[#allocation2 + $0x4] ss:$8 sps:$4 sm:$0xff]   ;;  %v426_v12 = vld [vmem:[#allocation2 + $0x14] ss:$8 sps:$4 sm:$0xff]   ;;  %v421_v18 = vld [vmem:[#allocation2] ss:$8 sps:$4 sm:$0xff]  }
  0x3d   :  { %v416_v13 = vld [vmem:[#allocation5 + $0x28] sm:$0xff]   ;;  %v417_v14 = vld [vmem:[#allocation5 + $0x70] sm:$0xff]   ;;  %246 = vmatprep.mubr.bf16.mxu0 %v423_v11  ;;  %254 = vmatprep.mubr.bf16.mxu1 %v426_v12  ;;  %v419_v16 = vld [vmem:[#allocation5 + $0x78] sm:$0xff]   ;;  %p500_p13 = por %p499_p12, %p498_p11 }
  0x3e   :  { %356 = vmatpush3.bf16.msra.mxu0 %v408_v3  ;;  %390 = vmatpush3.bf16.msra.mxu1 %v408_v3  ;;  %v418_v15 = vld [vmem:[#allocation5 + $0x30] sm:$0xff]   ;;  %v420_v17 = vld [vmem:[#allocation5 + $0x38] sm:$0xff]   ;;  %v313_v22 = vld [vmem:[#allocation7] ss:$0 sm:$0xff] }
  0x3f   :  { %357 = vmatprep.subr.bf16.mxu0 %v409_v4  ;;  %383 = vmatprep.subr.bf16.mxu1 %v409_v4  ;;  %v424_v19 = vld [vmem:[#allocation2 + $0x10] ss:$8 sps:$4 sm:$0xff]   ;;  %p501_p0 = pnand %p500_p13, %p494_p10 }
  0x42   :  { %358 = vmatpush3.bf16.msra.mxu0 %v410_v5  ;;  %391 = vmatpush3.bf16.msra.mxu1 %v410_v5 }
  0x43   :  { %359 = vmatprep.subr.bf16.mxu0 %v411_v6  ;;  %384 = vmatprep.subr.bf16.mxu1 %v411_v6 }
  0x46   :  { %360 = vmatpush3.bf16.msra.mxu0 %v412_v7  ;;  %392 = vmatpush3.bf16.msra.mxu1 %v412_v7 }
  0x47   :  { %361 = vmatprep.subr.bf16.mxu0 %v413_v8  ;;  %385 = vmatprep.subr.bf16.mxu1 %v413_v8 }
  0x4a   :  { %362 = vmatpush3.bf16.msra.mxu0 %v414_v9  ;;  %393 = vmatpush3.bf16.msra.mxu1 %v414_v9 }
  0x4b   :  { %363 = vmatprep.subr.bf16.mxu0 %v415_v10  ;;  %386 = vmatprep.subr.bf16.mxu1 %v415_v10 }
  0x4e   :  { %364 = vmatpush3.bf16.msra.mxu0 %v416_v13  ;;  %394 = vmatpush3.bf16.msra.mxu1 %v416_v13 }
  0x4f   :  { %365 = vmatprep.subr.bf16.mxu0 %v417_v14  ;;  %387 = vmatprep.subr.bf16.mxu1 %v417_v14 }
  0x52   :  { %366 = vmatpush3.bf16.msra.mxu0 %v418_v15  ;;  %395 = vmatpush3.bf16.msra.mxu1 %v418_v15 }
  0x53   :  { %367 = vmatprep.subr.bf16.mxu0 %v419_v16  ;;  %388 = vmatprep.subr.bf16.mxu1 %v419_v16 }
  0x56   :  { %368 = vmatpush3.bf16.msra.mxu0 %v420_v17  ;;  %396 = vmatpush3.bf16.msra.mxu1 %v420_v17 }
  0x59   :  { %247 = vmatmul.mubr.bf16.vlgmr.msra.gmra.mrb[0].mxu0 %v421_v18  ;;  %255 = vmatmul.mubr.bf16.vlgmr.msra.gmra.mrb[0].mxu1 %v424_v19 }
 0x12c   :  { %v369_v20 = vpop.f32.mrb[0].mxu0  ;;  %v375_v21 = vpop.f32.mrb[0].mxu1 }
 0x12d   :  { %v370_v23 = vpop.f32.mrb[1].mxu0  ;;  %v376_v24 = vpop.f32.mrb[1].mxu1 }
 0x12e   :  { %v371_v25 = vadd.f32 %v370_v23, %v369_v20  ;;  %v377_v26 = vadd.f32 %v376_v24, %v375_v21  ;;  %v372_v27 = vpop.f32.mrb[2].mxu0  ;;  %v378_v28 = vpop.f32.mrb[2].mxu1 }
 0x12f   :  { %v373_v29 = vpop.f32.mrb[3].mxu0  ;;  %v379_v30 = vpop.f32.mrb[3].mxu1 }
 0x130   :  { %v249_v31 = vadd.f32 %v371_v25, %v313_v22  ;;  %v257_v32 = vadd.f32 %v377_v26, %v313_v22  ;;  %v374_v33 = vadd.f32 %v373_v29, %v372_v27  ;;  %v380_v34 = vadd.f32 %v379_v30, %v378_v28 }
 0x132   :  { %v267_v35 = vmul.f32 0.01, %v249_v31  ;;  %v269_v36 = vmul.f32 0.01, %v257_v32  ;;  %v252_v37 = vadd.f32 %v374_v33, %v313_v22  ;;  %v260_v38 = vadd.f32 %v380_v34, %v313_v22 }
 0x133   :  { %vm263_vm0 = vcmp.gt.f32.partialorder %v249_v31, 0.0  ;;  %vm265_vm1 = vcmp.gt.f32.partialorder %v257_v32, 0.0 }
 0x134   :  { %vm264_vm2 = vcmp.gt.f32.partialorder %v252_v37, 0.0  ;;  %v268_v39 = vmul.f32 0.01, %v252_v37  ;;  %vm266_vm3 = vcmp.gt.f32.partialorder %v260_v38, 0.0  ;;  %v270_v40 = vmul.f32 0.01, %v260_v38 }
 0x135   :  { %v271_v41 = vsel %vm263_vm0, %v249_v31, %v267_v35  ;;  %v273_v43 = vsel %vm265_vm1, %v257_v32, %v269_v36 }
 0x136   :  { %v272_v42 = vsel %vm264_vm2, %v252_v37, %v268_v39  ;;  %v274_v44 = vsel %vm266_vm3, %v260_v38, %v270_v40 }
 0x137   :  { %v345_v45 = vpack.c.bf16 %v272_v42, %v271_v41  ;;  %v350_v46 = vpack.c.bf16 %v274_v44, %v273_v43 }
 0x139   :  { %346 = vst [vmem:[#allocation8] sm:$0xff] %v345_v45   ;;  %352 = vst [vmem:[#allocation8 + $0x8] sm:$0xff] %v350_v46  }
 0x13a   :  { %504 = shalt.err (!%p501_p0)
}
 0x13b   :  { %s505_s30 = scalar_lea.hbm %s606_s3, 256 }
 0x13c   :  { %p506_p1 = scmp.ne.s32.totalorder %s606_s3, %s505_s30  ;;  %p509_p2 = scmp.lt.u32.totalorder %s505_s30, %s606_s3 }
 0x13e   :  { %p511_p3 = pnand %p509_p2, %p506_p1 }
 0x140   :  { %514 = shalt.err (!%p511_p3)
}
 0x141   :  { %306 = dma.vmem_to_hbm [thread:$0]  %s301_s26, 256, %s606_s3, [#allocation4], %s522_s22, %s522_s22, %s523_s23  }
 0x142   :  { %519 = dma.done.wait [#allocation4], 256  }
 0x143   :  { %520 = vsyncadd [#allocation4], 4294967040 }
 0x144   :  { %310 = vsyncpa [#allocation3], 1 }
 0x145   :  { %311 = vsyncpa [#allocation6], 1 }
 0x146   :  { %312 = vsyncpa [#allocation4], 1 }

// kernel: _lambda_.9
= control target key start
LH: loop header
LB: loop body
LE: loop exit
PB: predicated region body
PF: predicated region fallthrough
CT: control target
= control target key end

     0   :  { %8 = vsyncpa [#allocation3], 0  ;;  %s720_s0 = inlined_call_operand.hbm [shape: bf16[8,512], index: 0, kind: input, shape index: {}]   ;;  %s721_s1 = inlined_call_operand.hbm [shape: bf16[512,128], index: 1, kind: input, shape index: {}]   ;;  %s722_s2 = inlined_call_operand.hbm [shape: f32[1,128], index: 2, kind: input, shape index: {}]   ;;  %s723_s3 = inlined_call_operand.hbm [shape: f32[8,128], index: 3, kind: output, shape index: {}]  }
   0x1   :  { %9 = vsyncpa [#allocation6], 0 }
   0x2   :  { %10 = vsyncpa [#allocation4], 0  ;;  %s646_s12 = smov [#allocation5]   ;;  %s552_s16 = scalar_lea.hbm %s721_s1, 4096 }
   0x3   :  { %s26_s13 = sshll.u32 %s646_s12, 4  ;;  %p553_p0 = scmp.ne.s32.totalorder %s721_s1, %s552_s16  ;;  %s27_s13 = int_to_ptr.vmem [resolvable:$true] %s26_s13 }
   0x4   :  { %p556_p1 = scmp.lt.u32.totalorder %s552_s16, %s721_s1 }
   0x6   :  { %p558_p2 = pnand %p556_p1, %p553_p0 }
   0x8   :  { %561 = shalt.err (!%p558_p2)
}
   0x9   :  { %s562_s21 = scalar_lea.vmem %s27_s13, 4096  ;;  %p567_p4 = scmp.lt.s32.totalorder %s27_s13, %s27_s13 }
   0xa   :  { %p563_p3 = scmp.ne.s32.totalorder %s27_s13, %s562_s21  ;;  %p568_p5 = scmp.lt.s32.totalorder %s562_s21, %s562_s21 }
   0xc   :  { %p569_p6 = por %p568_p5, %p567_p4 }
   0xe   :  { %p570_p7 = pnand %p569_p6, %p563_p3 }
  0x10   :  { %573 = shalt.err (!%p570_p7)
}
  0x11   :  { %s647_s22 = smov 64   ;;  %s648_s23 = smov 4  }
  0x12   :  { %32 = dma.hbm_to_vmem [thread:$0]  %s721_s1, 4096, %s27_s13, [#allocation6], %s647_s22, %s647_s22, %s648_s23  }
  0x13   :  { %s649_s26 = smov [#allocation2]   ;;  %s650_s28 = smov [#allocation7]  }
  0x14   :  { %s17_s27 = sshll.u32 %s649_s26, 4  ;;  %s39_s29 = sshll.u32 %s650_s28, 4  ;;  %s18_s27 = int_to_ptr.vmem [resolvable:$true] %s17_s27  ;;  %s40_s29 = int_to_ptr.vmem [resolvable:$true] %s39_s29 }
  0x15   :  { %s574_s5 = scalar_lea.hbm %s720_s0, 256 }
  0x16   :  { %p575_p8 = scmp.ne.s32.totalorder %s720_s0, %s574_s5  ;;  %p578_p9 = scmp.lt.u32.totalorder %s574_s5, %s720_s0 }
  0x18   :  { %p580_p10 = pnand %p578_p9, %p575_p8 }
  0x1a   :  { %583 = shalt.err (!%p580_p10)
}
  0x1b   :  { %s584_s1 = scalar_lea.vmem %s18_s27, 256  ;;  %p589_p12 = scmp.lt.s32.totalorder %s18_s27, %s18_s27 }
  0x1c   :  { %p585_p11 = scmp.ne.s32.totalorder %s18_s27, %s584_s1  ;;  %p590_p13 = scmp.lt.s32.totalorder %s584_s1, %s584_s1 }
  0x1e   :  { %p591_p0 = por %p590_p13, %p589_p12 }
  0x20   :  { %p592_p1 = pnand %p591_p0, %p585_p11 }
  0x22   :  { %595 = shalt.err (!%p592_p1)
}
  0x23   :  { %20 = dma.hbm_to_vmem [thread:$0]  %s720_s0, 256, %s18_s27, [#allocation3]  }
  0x24   :  { %s596_s14 = scalar_lea.hbm %s722_s2, 16 }
  0x25   :  { %p597_p2 = scmp.ne.s32.totalorder %s722_s2, %s596_s14  ;;  %p600_p3 = scmp.lt.u32.totalorder %s596_s14, %s722_s2 }
  0x27   :  { %p602_p4 = pnand %p600_p3, %p597_p2 }
  0x29   :  { %605 = shalt.err (!%p602_p4)
}
  0x2a   :  { %s606_s19 = scalar_lea.vmem %s40_s29, 16  ;;  %s610_s20 = scalar_lea.vmem %s40_s29, 32 }
  0x2b   :  { %p607_p5 = scmp.ne.s32.totalorder %s40_s29, %s606_s19  ;;  %p611_p6 = scmp.lt.s32.totalorder %s40_s29, %s40_s29 }
  0x2c   :  { %p612_p7 = scmp.lt.s32.totalorder %s610_s20, %s606_s19 }
  0x2e   :  { %p613_p8 = por %p612_p7, %p611_p6 }
  0x30   :  { %p614_p9 = pnand %p613_p8, %p607_p5 }
  0x32   :  { %617 = shalt.err (!%p614_p9)
}
  0x33   :  { %42 = dma.hbm_to_vmem [thread:$0]  %s722_s2, 16, %s40_s29, [#allocation6]  }
  0x34   :  { %640 = dma.done.wait [#allocation3], 256  }
  0x35   :  { %641 = vsyncadd [#allocation3], 4294967040 }
  0x36   :  { %642 = dma.done.wait [#allocation6], 4112  }
  0x37   :  { %643 = vsyncadd [#allocation6], 4294963184  ;;  %v516_v0 = vld [vmem:[#allocation5 + $0x40] sm:$0xff]   ;;  %v520_v4 = vld [vmem:[#allocation5 + $0x48] sm:$0xff]   ;;  %s651_s2 = smov [#allocation8]  }
  0x38   :  { %v517_v1 = vld [vmem:[#allocation5 + $0xc0] sm:$0xff]   ;;  %466 = vmatprep.subr.bf16.mxu0 %v516_v0  ;;  %v521_v5 = vld [vmem:[#allocation5 + $0xc8] sm:$0xff]   ;;  %v524_v8 = vld [vmem:[#allocation5 + $0x50] sm:$0xff]   ;;  %s419_s22 = sshll.u32 %s651_s2, 4  ;;  %s420_s22 = int_to_ptr.vmem [resolvable:$true] %s419_s22 }
  0x39   :  { %v518_v2 = vld [vmem:[#allocation5] sm:$0xff]   ;;  %488 = vmatprep.subr.bf16.mxu1 %v517_v1  ;;  %v522_v6 = vld [vmem:[#allocation5 + $0x8] sm:$0xff]   ;;  %v525_v9 = vld [vmem:[#allocation5 + $0xd0] sm:$0xff]   ;;  %s618_s23 = scalar_lea.vmem %s420_s22, 128  ;;  %p623_p11 = scmp.lt.s32.totalorder %s420_s22, %s420_s22 }
  0x3a   :  { %v519_v3 = vld [vmem:[#allocation5 + $0x80] sm:$0xff]   ;;  %467 = vmatpush3.bf16.msra.mxu0 %v518_v2  ;;  %v523_v7 = vld [vmem:[#allocation5 + $0x88] sm:$0xff]   ;;  %v526_v10 = vld [vmem:[#allocation5 + $0x10] sm:$0xff]   ;;  %p619_p10 = scmp.ne.s32.totalorder %s420_s22, %s618_s23  ;;  %p624_p12 = scmp.lt.s32.totalorder %s618_s23, %s618_s23 }
  0x3b   :  { %489 = vmatpush3.bf16.msra.mxu1 %v519_v3  ;;  %468 = vmatprep.subr.bf16.mxu0 %v520_v4  ;;  %v527_v11 = vld [vmem:[#allocation5 + $0x90] sm:$0xff]   ;;  %v528_v12 = vld [vmem:[#allocation5 + $0x58] sm:$0xff]   ;;  %v532_v16 = vld [vmem:[#allocation5 + $0x60] sm:$0xff]  }
  0x3c   :  { %490 = vmatprep.subr.bf16.mxu1 %v521_v5  ;;  %v529_v13 = vld [vmem:[#allocation5 + $0xd8] sm:$0xff]   ;;  %v533_v17 = vld [vmem:[#allocation5 + $0xe0] sm:$0xff]   ;;  %v536_v20 = vld [vmem:[#allocation5 + $0x68] sm:$0xff]   ;;  %p625_p13 = por %p624_p12, %p623_p11 }
  0x3d   :  { %v530_v14 = vld [vmem:[#allocation5 + $0x18] sm:$0xff]   ;;  %v534_v18 = vld [vmem:[#allocation5 + $0x20] sm:$0xff]   ;;  %v537_v21 = vld [vmem:[#allocation5 + $0xe8] sm:$0xff]  }
  0x3e   :  { %469 = vmatpush3.bf16.msra.mxu0 %v522_v6  ;;  %v531_v15 = vld [vmem:[#allocation5 + $0x98] sm:$0xff]   ;;  %v535_v19 = vld [vmem:[#allocation5 + $0xa0] sm:$0xff]   ;;  %v538_v22 = vld [vmem:[#allocation5 + $0x28] sm:$0xff]   ;;  %p626_p0 = pnand %p625_p13, %p619_p10 }
  0x3f   :  { %491 = vmatpush3.bf16.msra.mxu1 %v523_v7  ;;  %470 = vmatprep.subr.bf16.mxu0 %v524_v8  ;;  %v539_v23 = vld [vmem:[#allocation5 + $0xa8] sm:$0xff]   ;;  %v540_v24 = vld [vmem:[#allocation5 + $0x70] sm:$0xff]   ;;  %v544_v28 = vld [vmem:[#allocation5 + $0x78] sm:$0xff]  }
  0x40   :  { %492 = vmatprep.subr.bf16.mxu1 %v525_v9  ;;  %v541_v25 = vld [vmem:[#allocation5 + $0xf0] sm:$0xff]   ;;  %v545_v29 = vld [vmem:[#allocation5 + $0xf8] sm:$0xff]   ;;  %v429_v40 = vld [vmem:[#allocation7] ss:$0 sm:$0xff] }
  0x41   :  { %v542_v26 = vld [vmem:[#allocation5 + $0x30] sm:$0xff]   ;;  %v546_v30 = vld [vmem:[#allocation5 + $0x38] sm:$0xff]  }
  0x42   :  { %471 = vmatpush3.bf16.msra.mxu0 %v526_v10  ;;  %v543_v27 = vld [vmem:[#allocation5 + $0xb0] sm:$0xff]   ;;  %v547_v31 = vld [vmem:[#allocation5 + $0xb8] sm:$0xff]  }
  0x43   :  { %493 = vmatpush3.bf16.msra.mxu1 %v527_v11  ;;  %472 = vmatprep.subr.bf16.mxu0 %v528_v12  ;;  %v53_v32 = vld [vmem:[#allocation2] sm:$0xff]  ;;  %v54_v33 = vld [vmem:[#allocation2 + $0x8] sm:$0xff] }
  0x44   :  { %494 = vmatprep.subr.bf16.mxu1 %v529_v13  ;;  %v430_v34 = vcombine.low %v53_v32, %v53_v32  ;;  %v431_v35 = vcombine.high %v53_v32, %v53_v32  ;;  %v432_v36 = vcombine.low %v54_v33, %v54_v33  ;;  %v433_v37 = vcombine.high %v54_v33, %v54_v33 }
  0x46   :  { %473 = vmatpush3.bf16.msra.mxu0 %v530_v14  ;;  %364 = vmatprep.mubr.bf16.mxu0 %v431_v35 }
  0x47   :  { %495 = vmatpush3.bf16.msra.mxu1 %v531_v15  ;;  %474 = vmatprep.subr.bf16.mxu0 %v532_v16 }
  0x48   :  { %496 = vmatprep.subr.bf16.mxu1 %v533_v17  ;;  %404 = vmatprep.mubr.bf16.mxu1 %v433_v37 }
  0x4a   :  { %475 = vmatpush3.bf16.msra.mxu0 %v534_v18 }
  0x4b   :  { %497 = vmatpush3.bf16.msra.mxu1 %v535_v19  ;;  %476 = vmatprep.subr.bf16.mxu0 %v536_v20 }
  0x4c   :  { %498 = vmatprep.subr.bf16.mxu1 %v537_v21 }
  0x4e   :  { %477 = vmatpush3.bf16.msra.mxu0 %v538_v22 }
  0x4f   :  { %499 = vmatpush3.bf16.msra.mxu1 %v539_v23  ;;  %478 = vmatprep.subr.bf16.mxu0 %v540_v24 }
  0x50   :  { %500 = vmatprep.subr.bf16.mxu1 %v541_v25 }
  0x52   :  { %479 = vmatpush3.bf16.msra.mxu0 %v542_v26 }
  0x53   :  { %501 = vmatpush3.bf16.msra.mxu1 %v543_v27  ;;  %480 = vmatprep.subr.bf16.mxu0 %v544_v28 }
  0x54   :  { %502 = vmatprep.subr.bf16.mxu1 %v545_v29 }
  0x56   :  { %481 = vmatpush3.bf16.msra.mxu0 %v546_v30 }
  0x57   :  { %503 = vmatpush3.bf16.msra.mxu1 %v547_v31 }
  0x59   :  { %365 = vmatmul.mubr.bf16.vlgmr.msra.gmra.mrb[0].mxu0 %v430_v34 }
  0x5a   :  { %405 = vmatmul.mubr.bf16.vlgmr.msra.gmra.mrb[0].mxu1 %v432_v36 }
 0x12c   :  { %v482_v38 = vpop.f32.mrb[0].mxu0 }
 0x12d   :  { %v504_v39 = vpop.f32.mrb[0].mxu1  ;;  %v483_v41 = vpop.f32.mrb[1].mxu0 }
 0x12e   :  { %v505_v42 = vpop.f32.mrb[1].mxu1  ;;  %v484_v43 = vadd.f32 %v483_v41, %v482_v38  ;;  %v485_v45 = vpop.f32.mrb[2].mxu0 }
 0x12f   :  { %v506_v44 = vadd.f32 %v505_v42, %v504_v39  ;;  %v507_v46 = vpop.f32.mrb[2].mxu1  ;;  %v486_v47 = vpop.f32.mrb[3].mxu0 }
 0x130   :  { %v508_v48 = vpop.f32.mrb[3].mxu1  ;;  %v367_v49 = vadd.f32 %v484_v43, %v429_v40 }
 0x132   :  { %v407_v50 = vadd.f32 %v506_v44, %v367_v49 }
 0x134   :  { %412 = vst [vmem:[#allocation8] sm:$0xff] %v407_v50 }
 0x135   :  { %629 = shalt.err (!%p626_p0)
}
 0x136   :  { %s630_s26 = scalar_lea.hbm %s723_s3, 128 }
 0x137   :  { %p631_p1 = scmp.ne.s32.totalorder %s723_s3, %s630_s26  ;;  %p634_p2 = scmp.lt.u32.totalorder %s630_s26, %s723_s3 }
 0x139   :  { %p636_p3 = pnand %p634_p2, %p631_p1 }
 0x13b   :  { %639 = shalt.err (!%p636_p3)
}
 0x13c   :  { %422 = dma.vmem_to_hbm [thread:$0]  %s420_s22, 128, %s723_s3, [#allocation4]  }
 0x13d   :  { %644 = dma.done.wait [#allocation4], 128  }
 0x13e   :  { %645 = vsyncadd [#allocation4], 4294967168 }
 0x13f   :  { %426 = vsyncpa [#allocation3], 1 }
 0x140   :  { %427 = vsyncpa [#allocation6], 1 }
 0x141   :  { %428 = vsyncpa [#allocation4], 1 }

// kernel: _lambda_.8
= control target key start
LH: loop header
LB: loop body
LE: loop exit
PB: predicated region body
PF: predicated region fallthrough
CT: control target
= control target key end

     0   :  { %8 = vsyncpa [#allocation3], 0  ;;  %s717_s0 = inlined_call_operand.hbm [shape: bf16[32,384], index: 0, kind: input, shape index: {}]   ;;  %s718_s1 = inlined_call_operand.hbm [shape: bf16[384,128], index: 1, kind: input, shape index: {}]   ;;  %s719_s2 = inlined_call_operand.hbm [shape: f32[1,128], index: 2, kind: input, shape index: {}]   ;;  %s720_s3 = inlined_call_operand.hbm [shape: f32[32,128], index: 3, kind: output, shape index: {}]  }
   0x1   :  { %9 = vsyncpa [#allocation6], 0 }
   0x2   :  { %10 = vsyncpa [#allocation4], 0  ;;  %s639_s12 = smov [#allocation5]   ;;  %s545_s16 = scalar_lea.hbm %s718_s1, 3072 }
   0x3   :  { %s28_s13 = sshll.u32 %s639_s12, 4  ;;  %p546_p0 = scmp.ne.s32.totalorder %s718_s1, %s545_s16  ;;  %s29_s13 = int_to_ptr.vmem [resolvable:$true] %s28_s13 }
   0x4   :  { %p549_p1 = scmp.lt.u32.totalorder %s545_s16, %s718_s1 }
   0x6   :  { %p551_p2 = pnand %p549_p1, %p546_p0 }
   0x8   :  { %554 = shalt.err (!%p551_p2)
}
   0x9   :  { %s555_s21 = scalar_lea.vmem %s29_s13, 3072  ;;  %p560_p4 = scmp.lt.s32.totalorder %s29_s13, %s29_s13 }
   0xa   :  { %p556_p3 = scmp.ne.s32.totalorder %s29_s13, %s555_s21  ;;  %p561_p5 = scmp.lt.s32.totalorder %s555_s21, %s555_s21 }
   0xc   :  { %p562_p6 = por %p561_p5, %p560_p4 }
   0xe   :  { %p563_p7 = pnand %p562_p6, %p556_p3 }
  0x10   :  { %566 = shalt.err (!%p563_p7)
}
  0x11   :  { %s640_s22 = smov 64   ;;  %s641_s23 = smov 4  }
  0x12   :  { %34 = dma.hbm_to_vmem [thread:$0]  %s718_s1, 3072, %s29_s13, [#allocation6], %s640_s22, %s640_s22, %s641_s23  }
  0x13   :  { %s642_s26 = smov [#allocation2]   ;;  %s567_s30 = scalar_lea.hbm %s717_s0, 768 }
  0x14   :  { %s16_s27 = sshll.u32 %s642_s26, 4  ;;  %p568_p8 = scmp.ne.s32.totalorder %s717_s0, %s567_s30  ;;  %s17_s27 = int_to_ptr.vmem [resolvable:$true] %s16_s27 }
  0x15   :  { %p571_p9 = scmp.lt.u32.totalorder %s567_s30, %s717_s0 }
  0x17   :  { %p573_p10 = pnand %p571_p9, %p568_p8 }
  0x19   :  { %576 = shalt.err (!%p573_p10)
}
  0x1a   :  { %s577_s8 = scalar_lea.vmem %s17_s27, 768  ;;  %p582_p12 = scmp.lt.s32.totalorder %s17_s27, %s17_s27 }
  0x1b   :  { %p578_p11 = scmp.ne.s32.totalorder %s17_s27, %s577_s8  ;;  %p583_p13 = scmp.lt.s32.totalorder %s577_s8, %s577_s8 }
  0x1d   :  { %p584_p0 = por %p583_p13, %p582_p12 }
  0x1f   :  { %p585_p1 = pnand %p584_p0, %p578_p11 }
  0x21   :  { %588 = shalt.err (!%p585_p1)
}
  0x22   :  { %s643_s1 = smov 192   ;;  %s644_s9 = smov 12  }
  0x23   :  { %22 = dma.hbm_to_vmem [thread:$0]  %s717_s0, 768, %s17_s27, [#allocation3], %s643_s1, %s643_s1, %s644_s9  }
  0x24   :  { %s645_s12 = smov [#allocation7]   ;;  %s589_s16 = scalar_lea.hbm %s719_s2, 16 }
  0x25   :  { %s41_s13 = sshll.u32 %s645_s12, 4  ;;  %p590_p2 = scmp.ne.s32.totalorder %s719_s2, %s589_s16  ;;  %s42_s13 = int_to_ptr.vmem [resolvable:$true] %s41_s13 }
  0x26   :  { %p593_p3 = scmp.lt.u32.totalorder %s589_s16, %s719_s2 }
  0x28   :  { %p595_p4 = pnand %p593_p3, %p590_p2 }
  0x2a   :  { %598 = shalt.err (!%p595_p4)
}
  0x2b   :  { %s599_s21 = scalar_lea.vmem %s42_s13, 16  ;;  %s603_s0 = scalar_lea.vmem %s42_s13, 32 }
  0x2c   :  { %p600_p5 = scmp.ne.s32.totalorder %s42_s13, %s599_s21  ;;  %p604_p6 = scmp.lt.s32.totalorder %s42_s13, %s42_s13 }
  0x2d   :  { %p605_p7 = scmp.lt.s32.totalorder %s603_s0, %s599_s21 }
  0x2f   :  { %p606_p8 = por %p605_p7, %p604_p6 }
  0x31   :  { %p607_p9 = pnand %p606_p8, %p600_p5 }
  0x33   :  { %610 = shalt.err (!%p607_p9)
}
  0x34   :  { %44 = dma.hbm_to_vmem [thread:$0]  %s719_s2, 16, %s42_s13, [#allocation6]  }
  0x35   :  { %633 = dma.done.wait [#allocation3], 768  }
  0x36   :  { %634 = vsyncadd [#allocation3], 4294966528 }
  0x37   :  { %635 = dma.done.wait [#allocation6], 3088  }
  0x38   :  { %636 = vsyncadd [#allocation6], 4294964208  ;;  %v513_v0 = vld [vmem:[#allocation5 + $0x40] sm:$0xff]   ;;  %v515_v2 = vld [vmem:[#allocation5 + $0x48] sm:$0xff]   ;;  %s646_s2 = smov [#allocation8]  }
  0x39   :  { %v514_v1 = vld [vmem:[#allocation5] sm:$0xff]   ;;  %445 = vmatprep.subr.bf16.mxu0 %v513_v0  ;;  %v517_v4 = vld [vmem:[#allocation5 + $0x8] sm:$0xff]   ;;  %v518_v5 = vld [vmem:[#allocation5 + $0x50] sm:$0xff]   ;;  %s401_s24 = sshll.u32 %s646_s2, 4  ;;  %s402_s24 = int_to_ptr.vmem [resolvable:$true] %s401_s24 }
  0x3a   :  { %446 = vmatpush3.bf16.msra.mxu0 %v514_v1  ;;  %v516_v3 = vld [vmem:[#allocation5 + $0x80] sm:$0xff]   ;;  %v519_v6 = vld [vmem:[#allocation5 + $0x88] sm:$0xff]   ;;  %v520_v7 = vld [vmem:[#allocation5 + $0x10] sm:$0xff]   ;;  %s611_s25 = scalar_lea.vmem %s402_s24, 512  ;;  %p616_p11 = scmp.lt.s32.totalorder %s402_s24, %s402_s24 }
  0x3b   :  { %447 = vmatprep.subr.bf16.mxu0 %v515_v2  ;;  %483 = vmatprep.subr.bf16.mxu1 %v516_v3  ;;  %v521_v8 = vld [vmem:[#allocation5 + $0x58] sm:$0xff]   ;;  %v522_v9 = vld [vmem:[#allocation5 + $0x90] sm:$0xff]   ;;  %v524_v11 = vld [vmem:[#allocation5 + $0x60] sm:$0xff]   ;;  %p612_p10 = scmp.ne.s32.totalorder %s402_s24, %s611_s25  ;;  %p617_p12 = scmp.lt.s32.totalorder %s611_s25, %s611_s25 }
  0x3c   :  { %484 = vmatpush3.bf16.msra.mxu1 %v516_v3  ;;  %v523_v10 = vld [vmem:[#allocation5 + $0x18] sm:$0xff]   ;;  %v526_v13 = vld [vmem:[#allocation5 + $0x20] sm:$0xff]   ;;  %v527_v15 = vld [vmem:[#allocation5 + $0x68] sm:$0xff]  }
  0x3d   :  { %485 = vmatprep.subr.bf16.mxu1 %v519_v6  ;;  %v525_v12 = vld [vmem:[#allocation5 + $0x98] sm:$0xff]   ;;  %v528_v14 = vld [vmem:[#allocation5 + $0xa0] sm:$0xff]   ;;  %v529_v16 = vld [vmem:[#allocation5 + $0x28] sm:$0xff]   ;;  %p618_p13 = por %p617_p12, %p616_p11 }
  0x3e   :  { %448 = vmatpush3.bf16.msra.mxu0 %v517_v4  ;;  %v531_v17 = vld [vmem:[#allocation5 + $0xa8] sm:$0xff]   ;;  %v530_v18 = vld [vmem:[#allocation5 + $0x70] sm:$0xff]   ;;  %v533_v20 = vld [vmem:[#allocation5 + $0x78] sm:$0xff]  }
  0x3f   :  { %449 = vmatprep.subr.bf16.mxu0 %v518_v5  ;;  %v532_v19 = vld [vmem:[#allocation5 + $0x30] sm:$0xff]   ;;  %v535_v23 = vld [vmem:[#allocation5 + $0x38] sm:$0xff]   ;;  %v414_v32 = vld [vmem:[#allocation7] ss:$0 sm:$0xff]  ;;  %p619_p0 = pnand %p618_p13, %p612_p10 }
  0x40   :  { %486 = vmatpush3.bf16.msra.mxu1 %v519_v6  ;;  %v534_v21 = vld [vmem:[#allocation5 + $0xb0] sm:$0xff]   ;;  %v540_v24 = vld [vmem:[#allocation2 + $0x8] ss:$12 sps:$4 sm:$0xff]  }
  0x41   :  { %487 = vmatprep.subr.bf16.mxu1 %v522_v9  ;;  %v538_v22 = vld [vmem:[#allocation2 + $0x4] ss:$12 sps:$4 sm:$0xff]   ;;  %v539_v25 = vld [vmem:[#allocation5 + $0xb8] sm:$0xff]   ;;  %499 = vmatprep.mubr.bf16.mxu1 %v540_v24 }
  0x42   :  { %450 = vmatpush3.bf16.msra.mxu0 %v520_v7  ;;  %326 = vmatprep.mubr.bf16.mxu0 %v538_v22  ;;  %v536_v26 = vld [vmem:[#allocation2] ss:$12 sps:$4 sm:$0xff]   ;;  %v542_v27 = vld [vmem:[#allocation2 + $0x1c] ss:$12 sps:$4 sm:$0xff]   ;;  %v544_v29 = vld [vmem:[#allocation2 + $0x18] ss:$12 sps:$4 sm:$0xff]  }
  0x43   :  { %451 = vmatprep.subr.bf16.mxu0 %v521_v8  ;;  %v541_v28 = vld [vmem:[#allocation2 + $0x20] ss:$12 sps:$4 sm:$0xff]  }
  0x44   :  { %488 = vmatpush3.bf16.msra.mxu1 %v522_v9 }
  0x45   :  { %489 = vmatprep.subr.bf16.mxu1 %v525_v12 }
  0x46   :  { %452 = vmatpush3.bf16.msra.mxu0 %v523_v10 }
  0x47   :  { %453 = vmatprep.subr.bf16.mxu0 %v524_v11 }
  0x48   :  { %490 = vmatpush3.bf16.msra.mxu1 %v525_v12 }
  0x49   :  { %491 = vmatprep.subr.bf16.mxu1 %v528_v14 }
  0x4a   :  { %454 = vmatpush3.bf16.msra.mxu0 %v526_v13 }
  0x4b   :  { %455 = vmatprep.subr.bf16.mxu0 %v527_v15 }
  0x4c   :  { %492 = vmatpush3.bf16.msra.mxu1 %v528_v14 }
  0x4d   :  { %493 = vmatprep.subr.bf16.mxu1 %v531_v17 }
  0x4e   :  { %456 = vmatpush3.bf16.msra.mxu0 %v529_v16 }
  0x4f   :  { %457 = vmatprep.subr.bf16.mxu0 %v530_v18 }
  0x50   :  { %494 = vmatpush3.bf16.msra.mxu1 %v531_v17 }
  0x51   :  { %495 = vmatprep.subr.bf16.mxu1 %v534_v21 }
  0x52   :  { %458 = vmatpush3.bf16.msra.mxu0 %v532_v19 }
  0x53   :  { %459 = vmatprep.subr.bf16.mxu0 %v533_v20 }
  0x54   :  { %496 = vmatpush3.bf16.msra.mxu1 %v534_v21 }
  0x55   :  { %497 = vmatprep.subr.bf16.mxu1 %v539_v25 }
  0x56   :  { %460 = vmatpush3.bf16.msra.mxu0 %v535_v23 }
  0x58   :  { %498 = vmatpush3.bf16.msra.mxu1 %v539_v25 }
  0x59   :  { %327 = vmatmul.mubr.bf16.vlgmr.msra.gmra.mrb[0].mxu0 %v536_v26 }
  0x5a   :  { %334 = vmatprep.mubr.bf16.mxu0 %v542_v27 }
  0x5b   :  { %500 = vmatmul.mubr.bf16.vlgmr.msra.gmra.mrb[0].mxu1 %v541_v28 }
  0x61   :  { %335 = vmatmul.mubr.bf16.gmra.mrb[4].mxu0 %v544_v29 }
 0x12c   :  { %v461_v30 = vpop.f32.mrb[0].mxu0 }
 0x12d   :  { %v462_v31 = vpop.f32.mrb[1].mxu0 }
 0x12e   :  { %v463_v33 = vadd.f32 %v462_v31, %v461_v30  ;;  %v464_v34 = vpop.f32.mrb[2].mxu0  ;;  %v501_v36 = vpop.f32.mrb[0].mxu1 }
 0x12f   :  { %v465_v35 = vpop.f32.mrb[3].mxu0  ;;  %v377_v39 = vpop.f32.mrb[1].mxu1 }
 0x130   :  { %v466_v37 = vadd.f32 %v465_v35, %v464_v34  ;;  %v329_v38 = vadd.f32 %v463_v33, %v414_v32  ;;  %v502_v40 = vpop.f32.mrb[2].mxu1 }
 0x131   :  { %v380_v43 = vpop.f32.mrb[3].mxu1 }
 0x132   :  { %v378_v41 = vadd.f32 %v377_v39, %v329_v38  ;;  %v332_v42 = vadd.f32 %v466_v37, %v414_v32 }
 0x134   :  { %392 = vst [vmem:[#allocation8] sm:$0xff] %v378_v41  ;;  %v381_v44 = vadd.f32 %v380_v43, %v332_v42  ;;  %v467_v45 = vpop.f32.mrb[4].mxu0 }
 0x135   :  { %v468_v46 = vpop.f32.mrb[5].mxu0 }
 0x136   :  { %393 = vst [vmem:[#allocation8 + $0x8] sm:$0xff] %v381_v44  ;;  %v469_v47 = vadd.f32 %v468_v46, %v467_v45  ;;  %v470_v48 = vpop.f32.mrb[6].mxu0 }
 0x137   :  { %v471_v49 = vpop.f32.mrb[7].mxu0 }
 0x138   :  { %v337_v50 = vadd.f32 %v469_v47, %v414_v32  ;;  %v472_v51 = vadd.f32 %v471_v49, %v470_v48 }
 0x13a   :  { %v386_v52 = vadd.f32 %v501_v36, %v337_v50  ;;  %v340_v53 = vadd.f32 %v472_v51, %v414_v32 }
 0x13c   :  { %394 = vst [vmem:[#allocation8 + $0x10] sm:$0xff] %v386_v52  ;;  %v389_v54 = vadd.f32 %v502_v40, %v340_v53 }
 0x13e   :  { %395 = vst [vmem:[#allocation8 + $0x18] sm:$0xff] %v389_v54 }
 0x13f   :  { %622 = shalt.err (!%p619_p0)
}
 0x140   :  { %s623_s28 = scalar_lea.hbm %s720_s3, 512 }
 0x141   :  { %p624_p1 = scmp.ne.s32.totalorder %s720_s3, %s623_s28  ;;  %p627_p2 = scmp.lt.u32.totalorder %s623_s28, %s720_s3 }
 0x143   :  { %p629_p3 = pnand %p627_p2, %p624_p1 }
 0x145   :  { %632 = shalt.err (!%p629_p3)
}
 0x146   :  { %s647_s6 = smov 128   ;;  %s648_s7 = smov 8  }
 0x147   :  { %407 = dma.vmem_to_hbm [thread:$0]  %s402_s24, 512, %s720_s3, [#allocation4], %s647_s6, %s647_s6, %s648_s7  }
 0x148   :  { %637 = dma.done.wait [#allocation4], 512  }
 0x149   :  { %638 = vsyncadd [#allocation4], 4294966784 }
 0x14a   :  { %411 = vsyncpa [#allocation3], 1 }
 0x14b   :  { %412 = vsyncpa [#allocation6], 1 }
 0x14c   :  { %413 = vsyncpa [#allocation4], 1 }

</bundles_post_ra>
